<compile_context>
chip_gen: v6e
topology: v6e:2x2x1
jax: 0.10.0
libtpu: 0.0.40
codegen_flags: <defaults>
</compile_context>

<pallas_src>
import functools

import jax
import jax.numpy as jnp
from jax import lax
from jax.experimental import pallas as pl
from jax.experimental.pallas import tpu as pltpu


# ------------------------------ Pallas kernel --------------------------------

def _fused_forward_kernel(x_ref, w1_ref, b1_ref, w2_ref, b2_ref,
                          mask_ref, pool_ref, w3t_ref, b3_ref, o_ref,
                          *, wp, margin, n_flat, n_ext, cin):
    """conv1+ReLU -> conv2+ReLU -> masked global-avg-pool -> linear head.

    Flat layout: activations are (channels, positions) slabs where `positions`
    enumerates b*Hp*Wp + r*Wp + c over the zero-padded (Hp, Wp) grid of every
    batch element.  A 3x3/pad=1 conv then becomes, for each of the 9 taps, a
    constant shift of the position axis (shift-conv / in-register im2col);
    positions in the padding ring pick up garbage that is zeroed by `mask_ref`
    (after conv1) or by `pool_ref` (after conv2).
    """
    taps = [(dy - 1) * wp + (dx - 1) for dy in range(3) for dx in range(3)]

    # ---- conv1 + bias + ReLU (+ zero the padding ring) ----------------------
    # Cin is tiny (single-channel spectrogram) -> cheap VPU broadcast-MACs;
    # output stays lane-dense: (C1, n_ext).
    h1 = None
    for t, off in enumerate(taps):
        start = margin + off
        for ci in range(cin):
            col = t * cin + ci
            term = (w1_ref[:, col:col + 1]
                    * x_ref[ci:ci + 1, start:start + n_ext])
            h1 = term if h1 is None else h1 + term
    h1 = jnp.maximum(h1 + b1_ref[...], 0.0) * mask_ref[...]      # (C1, n_ext)

    # ---- conv2 + bias + ReLU: 9 accumulating MXU matmuls --------------------
    h2 = None
    for t, off in enumerate(taps):
        start = margin + off
        part = jnp.dot(w2_ref[t], h1[:, start:start + n_flat],
                       preferred_element_type=jnp.float32)       # (C2, n_flat)
        h2 = part if h2 is None else h2 + part
    h2 = jnp.maximum(h2 + b2_ref[...], 0.0)                      # (C2, n_flat)

    # ---- global average pool (interior mask + 1/(H*W) folded into pool_ref) -
    pooled = jnp.dot(h2, pool_ref[...],
                     preferred_element_type=jnp.float32)         # (C2, B)

    # ---- classification head ------------------------------------------------
    logits_t = jnp.dot(w3t_ref[...], pooled,
                       preferred_element_type=jnp.float32) + b3_ref[...]
    o_ref[...] = logits_t.astype(o_ref.dtype)                    # (NCLS, B)


# -------------------------------- JAX wrapper ---------------------------------

def audio_classification_forward(x, params):
    """Mirrors AudioClassificationModel.forward in eval mode (NCHW input)."""
    B, Cin, H, W = x.shape
    C1 = params["w1"].shape[0]
    C2 = params["w2"].shape[0]
    NCLS = params["w3"].shape[1]

    Hp, Wp = H + 2, W + 2          # zero-padded spatial grid (pad=1)
    L = B * Hp * Wp                # flattened padded positions
    m = Wp + 1                     # max |tap offset| in the flat layout
    E = L + 2 * m                  # conv1 is computed on this extended width

    # ---- tiny layout prep (one small XLA fusion, a few KB) ------------------
    xp = jnp.pad(jnp.transpose(x, (1, 0, 2, 3)),
                 ((0, 0), (0, 0), (1, 1), (1, 1)))               # (Cin,B,Hp,Wp)
    x_flat = xp.reshape(Cin, L)
    x_in = jnp.pad(x_flat, ((0, 0), (2 * m, 2 * m)))             # (Cin, L+4m)

    # weights, rearranged once to match the in-kernel tap ordering
    w1_2d = jnp.transpose(params["w1"], (0, 2, 3, 1)).reshape(C1, 9 * Cin)
    w2_taps = jnp.transpose(params["w2"], (2, 3, 0, 1)).reshape(9, C2, C1)
    b1 = params["b1"].reshape(C1, 1)
    b2 = params["b2"].reshape(C2, 1)
    w3t = params["w3"].T                                          # (NCLS, C2)
    b3 = params["b3"].reshape(NCLS, 1)

    # shape-only constants (constant-folded at compile time)
    rows = lax.broadcasted_iota(jnp.int32, (Hp, Wp), 0)
    cols = lax.broadcasted_iota(jnp.int32, (Hp, Wp), 1)
    interior = ((rows >= 1) & (rows <= H) & (cols >= 1) & (cols <= W))
    mask_flat = jnp.tile(interior.reshape(-1).astype(x.dtype), B)       # (L,)
    mask_e = jnp.pad(mask_flat, (m, m)).reshape(1, E)                   # (1, E)
    batch_ids = jnp.arange(L, dtype=jnp.int32) // (Hp * Wp)
    one_hot = (batch_ids[:, None]
               == jnp.arange(B, dtype=jnp.int32)[None, :]).astype(x.dtype)
    pool_mat = mask_flat[:, None] * one_hot / float(H * W)              # (L, B)

    flops = (2 * C1 * 9 * Cin * E          # conv1
             + 2 * C2 * C1 * 9 * L         # conv2
             + 2 * C2 * L * B              # pool matmul
             + 2 * NCLS * C2 * B)          # head
    bytes_accessed = 4 * (x_in.size + w1_2d.size + b1.size + w2_taps.size
                          + b2.size + mask_e.size + pool_mat.size
                          + w3t.size + b3.size + NCLS * B)

    kernel = functools.partial(_fused_forward_kernel,
                               wp=Wp, margin=m, n_flat=L, n_ext=E, cin=Cin)
    vmem_spec = pl.BlockSpec(memory_space=pltpu.MemorySpace.VMEM)

    logits_t = pl.pallas_call(
        kernel,
        out_shape=jax.ShapeDtypeStruct((NCLS, B), x.dtype),
        in_specs=[vmem_spec] * 9,
        out_specs=vmem_spec,
        cost_estimate=pl.CostEstimate(flops=flops, transcendentals=0,
                                      bytes_accessed=bytes_accessed),
    )(x_in, w1_2d, b1, w2_taps, b2, mask_e, pool_mat, w3t, b3)

    return logits_t.T                                             # (B, NCLS)


# ------------------------------ pure-JAX reference ----------------------------

def _reference_forward(x, params):
    """XLA reference matching the PyTorch module (eval mode)."""
    dn = ("NCHW", "OIHW", "NCHW")
    h = lax.conv_general_dilated(x, params["w1"], (1, 1), ((1, 1), (1, 1)),
                                 dimension_numbers=dn, precision="highest")
    h = jnp.maximum(h + params["b1"][None, :, None, None], 0.0)
    h = lax.conv_general_dilated(h, params["w2"], (1, 1), ((1, 1), (1, 1)),
                                 dimension_numbers=dn, precision="highest")
    h = jnp.maximum(h + params["b2"][None, :, None, None], 0.0)
    pooled = h.mean(axis=(2, 3))
    return jnp.dot(pooled, params["w3"], precision="highest") + params["b3"]


# ------------------------------------ main ------------------------------------

if __name__ == "__main__":
    B, Cin, H, W = 2, 1, 16, 16        # (batch, channels, freq, time)
    C1, C2, NCLS = 8, 16, 10

    key = jax.random.PRNGKey(0)
    kx, k1, kb1, k2, kb2, k3, kb3 = jax.random.split(key, 7)

    x = jax.random.normal(kx, (B, Cin, H, W), dtype=jnp.float32)

    params = {
        "w1": jax.random.normal(k1, (C1, Cin, 3, 3), jnp.float32) * 0.1,
        "b1": jax.random.normal(kb1, (C1,), jnp.float32) * 0.01,
        "w2": jax.random.normal(k2, (C2, C1, 3, 3), jnp.float32) * 0.1,
        "b2": jax.random.normal(kb2, (C2,), jnp.float32) * 0.01,
        "w3": jax.random.normal(k3, (C2, NCLS), jnp.float32) * 0.1,
        "b3": jax.random.normal(kb3, (NCLS,), jnp.float32) * 0.01,
    }

    out = jax.jit(audio_classification_forward)(x, params)
    jax.block_until_ready(out)
    assert out.shape == (B, NCLS), out.shape
    assert out.dtype == jnp.float32

    ref = _reference_forward(x, params)
    max_err = float(jnp.max(jnp.abs(out - ref)))
    assert max_err < 1e-3, f"mismatch vs reference: {max_err}"
    print("KERNEL_OK")
</pallas_src>

<mosaic_0001>
module attributes {stable_mosaic.version = 11 : i64} {
  func.func @_fused_forward_kernel(%arg0: memref<1x724xf32, #tpu.memory_space<vmem>>, %arg1: memref<8x9xf32, #tpu.memory_space<vmem>>, %arg2: memref<8x1xf32, #tpu.memory_space<vmem>>, %arg3: memref<9x16x8xf32, #tpu.memory_space<vmem>>, %arg4: memref<16x1xf32, #tpu.memory_space<vmem>>, %arg5: memref<1x686xf32, #tpu.memory_space<vmem>>, %arg6: memref<648x2xf32, #tpu.memory_space<vmem>>, %arg7: memref<10x16xf32, #tpu.memory_space<vmem>>, %arg8: memref<10x1xf32, #tpu.memory_space<vmem>>, %arg9: memref<10x2xf32, #tpu.memory_space<vmem>>) attributes {dimension_semantics = [], scalar_prefetch = 0 : i64, scratch_operands = 0 : i64, tpu.core_type = #tpu.core_type<tc>} {
    %c0 = arith.constant 0 : index
    %c0_0 = arith.constant 0 : index
    %0 = vector.load %arg1[%c0, %c0_0] : memref<8x9xf32, #tpu.memory_space<vmem>>, vector<8x1xf32>
    %c0_1 = arith.constant 0 : index
    %c0_2 = arith.constant 0 : index
    %1 = vector.load %arg0[%c0_1, %c0_2] : memref<1x724xf32, #tpu.memory_space<vmem>>, vector<1x686xf32>
    %2 = vector.broadcast %0 : vector<8x1xf32> to vector<8x686xf32>
    %3 = vector.broadcast %1 : vector<1x686xf32> to vector<8x686xf32>
    %4 = arith.mulf %2, %3 : vector<8x686xf32>
    %c0_3 = arith.constant 0 : index
    %c1 = arith.constant 1 : index
    %5 = vector.load %arg1[%c0_3, %c1] : memref<8x9xf32, #tpu.memory_space<vmem>>, vector<8x1xf32>
    %c0_4 = arith.constant 0 : index
    %c1_5 = arith.constant 1 : index
    %6 = vector.load %arg0[%c0_4, %c1_5] : memref<1x724xf32, #tpu.memory_space<vmem>>, vector<1x686xf32>
    %7 = vector.broadcast %5 : vector<8x1xf32> to vector<8x686xf32>
    %8 = vector.broadcast %6 : vector<1x686xf32> to vector<8x686xf32>
    %9 = arith.mulf %7, %8 : vector<8x686xf32>
    %10 = arith.addf %4, %9 : vector<8x686xf32>
    %c0_6 = arith.constant 0 : index
    %c2 = arith.constant 2 : index
    %11 = vector.load %arg1[%c0_6, %c2] : memref<8x9xf32, #tpu.memory_space<vmem>>, vector<8x1xf32>
    %c0_7 = arith.constant 0 : index
    %c2_8 = arith.constant 2 : index
    %12 = vector.load %arg0[%c0_7, %c2_8] : memref<1x724xf32, #tpu.memory_space<vmem>>, vector<1x686xf32>
    %13 = vector.broadcast %11 : vector<8x1xf32> to vector<8x686xf32>
    %14 = vector.broadcast %12 : vector<1x686xf32> to vector<8x686xf32>
    %15 = arith.mulf %13, %14 : vector<8x686xf32>
    %16 = arith.addf %10, %15 : vector<8x686xf32>
    %c0_9 = arith.constant 0 : index
    %c3 = arith.constant 3 : index
    %17 = vector.load %arg1[%c0_9, %c3] : memref<8x9xf32, #tpu.memory_space<vmem>>, vector<8x1xf32>
    %c0_10 = arith.constant 0 : index
    %c18 = arith.constant 18 : index
    %18 = vector.load %arg0[%c0_10, %c18] : memref<1x724xf32, #tpu.memory_space<vmem>>, vector<1x686xf32>
    %19 = vector.broadcast %17 : vector<8x1xf32> to vector<8x686xf32>
    %20 = vector.broadcast %18 : vector<1x686xf32> to vector<8x686xf32>
    %21 = arith.mulf %19, %20 : vector<8x686xf32>
    %22 = arith.addf %16, %21 : vector<8x686xf32>
    %c0_11 = arith.constant 0 : index
    %c4 = arith.constant 4 : index
    %23 = vector.load %arg1[%c0_11, %c4] : memref<8x9xf32, #tpu.memory_space<vmem>>, vector<8x1xf32>
    %c0_12 = arith.constant 0 : index
    %c19 = arith.constant 19 : index
    %24 = vector.load %arg0[%c0_12, %c19] : memref<1x724xf32, #tpu.memory_space<vmem>>, vector<1x686xf32>
    %25 = vector.broadcast %23 : vector<8x1xf32> to vector<8x686xf32>
    %26 = vector.broadcast %24 : vector<1x686xf32> to vector<8x686xf32>
    %27 = arith.mulf %25, %26 : vector<8x686xf32>
    %28 = arith.addf %22, %27 : vector<8x686xf32>
    %c0_13 = arith.constant 0 : index
    %c5 = arith.constant 5 : index
    %29 = vector.load %arg1[%c0_13, %c5] : memref<8x9xf32, #tpu.memory_space<vmem>>, vector<8x1xf32>
    %c0_14 = arith.constant 0 : index
    %c20 = arith.constant 20 : index
    %30 = vector.load %arg0[%c0_14, %c20] : memref<1x724xf32, #tpu.memory_space<vmem>>, vector<1x686xf32>
    %31 = vector.broadcast %29 : vector<8x1xf32> to vector<8x686xf32>
    %32 = vector.broadcast %30 : vector<1x686xf32> to vector<8x686xf32>
    %33 = arith.mulf %31, %32 : vector<8x686xf32>
    %34 = arith.addf %28, %33 : vector<8x686xf32>
    %c0_15 = arith.constant 0 : index
    %c6 = arith.constant 6 : index
    %35 = vector.load %arg1[%c0_15, %c6] : memref<8x9xf32, #tpu.memory_space<vmem>>, vector<8x1xf32>
    %c0_16 = arith.constant 0 : index
    %c36 = arith.constant 36 : index
    %36 = vector.load %arg0[%c0_16, %c36] : memref<1x724xf32, #tpu.memory_space<vmem>>, vector<1x686xf32>
    %37 = vector.broadcast %35 : vector<8x1xf32> to vector<8x686xf32>
    %38 = vector.broadcast %36 : vector<1x686xf32> to vector<8x686xf32>
    %39 = arith.mulf %37, %38 : vector<8x686xf32>
    %40 = arith.addf %34, %39 : vector<8x686xf32>
    %c0_17 = arith.constant 0 : index
    %c7 = arith.constant 7 : index
    %41 = vector.load %arg1[%c0_17, %c7] : memref<8x9xf32, #tpu.memory_space<vmem>>, vector<8x1xf32>
    %c0_18 = arith.constant 0 : index
    %c37 = arith.constant 37 : index
    %42 = vector.load %arg0[%c0_18, %c37] : memref<1x724xf32, #tpu.memory_space<vmem>>, vector<1x686xf32>
    %43 = vector.broadcast %41 : vector<8x1xf32> to vector<8x686xf32>
    %44 = vector.broadcast %42 : vector<1x686xf32> to vector<8x686xf32>
    %45 = arith.mulf %43, %44 : vector<8x686xf32>
    %46 = arith.addf %40, %45 : vector<8x686xf32>
    %c0_19 = arith.constant 0 : index
    %c8 = arith.constant 8 : index
    %47 = vector.load %arg1[%c0_19, %c8] : memref<8x9xf32, #tpu.memory_space<vmem>>, vector<8x1xf32>
    %c0_20 = arith.constant 0 : index
    %c38 = arith.constant 38 : index
    %48 = vector.load %arg0[%c0_20, %c38] : memref<1x724xf32, #tpu.memory_space<vmem>>, vector<1x686xf32>
    %49 = vector.broadcast %47 : vector<8x1xf32> to vector<8x686xf32>
    %50 = vector.broadcast %48 : vector<1x686xf32> to vector<8x686xf32>
    %51 = arith.mulf %49, %50 : vector<8x686xf32>
    %52 = arith.addf %46, %51 : vector<8x686xf32>
    %c0_21 = arith.constant 0 : index
    %c0_22 = arith.constant 0 : index
    %53 = vector.load %arg2[%c0_21, %c0_22] : memref<8x1xf32, #tpu.memory_space<vmem>>, vector<8x1xf32>
    %54 = vector.broadcast %53 : vector<8x1xf32> to vector<8x686xf32>
    %55 = arith.addf %52, %54 : vector<8x686xf32>
    %cst = arith.constant 0.000000e+00 : f32
    %56 = vector.broadcast %cst : f32 to vector<8x686xf32>
    %57 = arith.maximumf %55, %56 : vector<8x686xf32>
    %c0_23 = arith.constant 0 : index
    %c0_24 = arith.constant 0 : index
    %58 = vector.load %arg5[%c0_23, %c0_24] : memref<1x686xf32, #tpu.memory_space<vmem>>, vector<1x686xf32>
    %59 = vector.broadcast %58 : vector<1x686xf32> to vector<8x686xf32>
    %60 = arith.mulf %57, %59 : vector<8x686xf32>
    %c0_25 = arith.constant 0 : index
    %c0_26 = arith.constant 0 : index
    %c0_27 = arith.constant 0 : index
    %61 = vector.load %arg3[%c0_25, %c0_26, %c0_27] : memref<9x16x8xf32, #tpu.memory_space<vmem>>, vector<1x16x8xf32>
    %62 = vector.shape_cast %61 : vector<1x16x8xf32> to vector<16x8xf32>
    %63 = vector.extract_strided_slice %60 {offsets = [0, 0], sizes = [8, 648], strides = [1, 1]} : vector<8x686xf32> to vector<8x648xf32>
    %cst_28 = arith.constant dense<0.000000e+00> : vector<16x648xf32>
    %64 = tpu.matmul %62, %63, %cst_28 {dimension_numbers = #tpu.dot_dimension_numbers<[1], [0], [0], [1], [0, 0, 1, 1], [], []>} : vector<16x8xf32>, vector<8x648xf32>, vector<16x648xf32> -> vector<16x648xf32>
    %c1_29 = arith.constant 1 : index
    %c0_30 = arith.constant 0 : index
    %c0_31 = arith.constant 0 : index
    %65 = vector.load %arg3[%c1_29, %c0_30, %c0_31] : memref<9x16x8xf32, #tpu.memory_space<vmem>>, vector<1x16x8xf32>
    %66 = vector.shape_cast %65 : vector<1x16x8xf32> to vector<16x8xf32>
    %67 = vector.extract_strided_slice %60 {offsets = [0, 1], sizes = [8, 648], strides = [1, 1]} : vector<8x686xf32> to vector<8x648xf32>
    %cst_32 = arith.constant dense<0.000000e+00> : vector<16x648xf32>
    %68 = tpu.matmul %66, %67, %cst_32 {dimension_numbers = #tpu.dot_dimension_numbers<[1], [0], [0], [1], [0, 0, 1, 1], [], []>} : vector<16x8xf32>, vector<8x648xf32>, vector<16x648xf32> -> vector<16x648xf32>
    %69 = arith.addf %64, %68 : vector<16x648xf32>
    %c2_33 = arith.constant 2 : index
    %c0_34 = arith.constant 0 : index
    %c0_35 = arith.constant 0 : index
    %70 = vector.load %arg3[%c2_33, %c0_34, %c0_35] : memref<9x16x8xf32, #tpu.memory_space<vmem>>, vector<1x16x8xf32>
    %71 = vector.shape_cast %70 : vector<1x16x8xf32> to vector<16x8xf32>
    %72 = vector.extract_strided_slice %60 {offsets = [0, 2], sizes = [8, 648], strides = [1, 1]} : vector<8x686xf32> to vector<8x648xf32>
    %cst_36 = arith.constant dense<0.000000e+00> : vector<16x648xf32>
    %73 = tpu.matmul %71, %72, %cst_36 {dimension_numbers = #tpu.dot_dimension_numbers<[1], [0], [0], [1], [0, 0, 1, 1], [], []>} : vector<16x8xf32>, vector<8x648xf32>, vector<16x648xf32> -> vector<16x648xf32>
    %74 = arith.addf %69, %73 : vector<16x648xf32>
    %c3_37 = arith.constant 3 : index
    %c0_38 = arith.constant 0 : index
    %c0_39 = arith.constant 0 : index
    %75 = vector.load %arg3[%c3_37, %c0_38, %c0_39] : memref<9x16x8xf32, #tpu.memory_space<vmem>>, vector<1x16x8xf32>
    %76 = vector.shape_cast %75 : vector<1x16x8xf32> to vector<16x8xf32>
    %77 = vector.extract_strided_slice %60 {offsets = [0, 18], sizes = [8, 648], strides = [1, 1]} : vector<8x686xf32> to vector<8x648xf32>
    %cst_40 = arith.constant dense<0.000000e+00> : vector<16x648xf32>
    %78 = tpu.matmul %76, %77, %cst_40 {dimension_numbers = #tpu.dot_dimension_numbers<[1], [0], [0], [1], [0, 0, 1, 1], [], []>} : vector<16x8xf32>, vector<8x648xf32>, vector<16x648xf32> -> vector<16x648xf32>
    %79 = arith.addf %74, %78 : vector<16x648xf32>
    %c4_41 = arith.constant 4 : index
    %c0_42 = arith.constant 0 : index
    %c0_43 = arith.constant 0 : index
    %80 = vector.load %arg3[%c4_41, %c0_42, %c0_43] : memref<9x16x8xf32, #tpu.memory_space<vmem>>, vector<1x16x8xf32>
    %81 = vector.shape_cast %80 : vector<1x16x8xf32> to vector<16x8xf32>
    %82 = vector.extract_strided_slice %60 {offsets = [0, 19], sizes = [8, 648], strides = [1, 1]} : vector<8x686xf32> to vector<8x648xf32>
    %cst_44 = arith.constant dense<0.000000e+00> : vector<16x648xf32>
    %83 = tpu.matmul %81, %82, %cst_44 {dimension_numbers = #tpu.dot_dimension_numbers<[1], [0], [0], [1], [0, 0, 1, 1], [], []>} : vector<16x8xf32>, vector<8x648xf32>, vector<16x648xf32> -> vector<16x648xf32>
    %84 = arith.addf %79, %83 : vector<16x648xf32>
    %c5_45 = arith.constant 5 : index
    %c0_46 = arith.constant 0 : index
    %c0_47 = arith.constant 0 : index
    %85 = vector.load %arg3[%c5_45, %c0_46, %c0_47] : memref<9x16x8xf32, #tpu.memory_space<vmem>>, vector<1x16x8xf32>
    %86 = vector.shape_cast %85 : vector<1x16x8xf32> to vector<16x8xf32>
    %87 = vector.extract_strided_slice %60 {offsets = [0, 20], sizes = [8, 648], strides = [1, 1]} : vector<8x686xf32> to vector<8x648xf32>
    %cst_48 = arith.constant dense<0.000000e+00> : vector<16x648xf32>
    %88 = tpu.matmul %86, %87, %cst_48 {dimension_numbers = #tpu.dot_dimension_numbers<[1], [0], [0], [1], [0, 0, 1, 1], [], []>} : vector<16x8xf32>, vector<8x648xf32>, vector<16x648xf32> -> vector<16x648xf32>
    %89 = arith.addf %84, %88 : vector<16x648xf32>
    %c6_49 = arith.constant 6 : index
    %c0_50 = arith.constant 0 : index
    %c0_51 = arith.constant 0 : index
    %90 = vector.load %arg3[%c6_49, %c0_50, %c0_51] : memref<9x16x8xf32, #tpu.memory_space<vmem>>, vector<1x16x8xf32>
    %91 = vector.shape_cast %90 : vector<1x16x8xf32> to vector<16x8xf32>
    %92 = vector.extract_strided_slice %60 {offsets = [0, 36], sizes = [8, 648], strides = [1, 1]} : vector<8x686xf32> to vector<8x648xf32>
    %cst_52 = arith.constant dense<0.000000e+00> : vector<16x648xf32>
    %93 = tpu.matmul %91, %92, %cst_52 {dimension_numbers = #tpu.dot_dimension_numbers<[1], [0], [0], [1], [0, 0, 1, 1], [], []>} : vector<16x8xf32>, vector<8x648xf32>, vector<16x648xf32> -> vector<16x648xf32>
    %94 = arith.addf %89, %93 : vector<16x648xf32>
    %c7_53 = arith.constant 7 : index
    %c0_54 = arith.constant 0 : index
    %c0_55 = arith.constant 0 : index
    %95 = vector.load %arg3[%c7_53, %c0_54, %c0_55] : memref<9x16x8xf32, #tpu.memory_space<vmem>>, vector<1x16x8xf32>
    %96 = vector.shape_cast %95 : vector<1x16x8xf32> to vector<16x8xf32>
    %97 = vector.extract_strided_slice %60 {offsets = [0, 37], sizes = [8, 648], strides = [1, 1]} : vector<8x686xf32> to vector<8x648xf32>
    %cst_56 = arith.constant dense<0.000000e+00> : vector<16x648xf32>
    %98 = tpu.matmul %96, %97, %cst_56 {dimension_numbers = #tpu.dot_dimension_numbers<[1], [0], [0], [1], [0, 0, 1, 1], [], []>} : vector<16x8xf32>, vector<8x648xf32>, vector<16x648xf32> -> vector<16x648xf32>
    %99 = arith.addf %94, %98 : vector<16x648xf32>
    %c8_57 = arith.constant 8 : index
    %c0_58 = arith.constant 0 : index
    %c0_59 = arith.constant 0 : index
    %100 = vector.load %arg3[%c8_57, %c0_58, %c0_59] : memref<9x16x8xf32, #tpu.memory_space<vmem>>, vector<1x16x8xf32>
    %101 = vector.shape_cast %100 : vector<1x16x8xf32> to vector<16x8xf32>
    %102 = vector.extract_strided_slice %60 {offsets = [0, 38], sizes = [8, 648], strides = [1, 1]} : vector<8x686xf32> to vector<8x648xf32>
    %cst_60 = arith.constant dense<0.000000e+00> : vector<16x648xf32>
    %103 = tpu.matmul %101, %102, %cst_60 {dimension_numbers = #tpu.dot_dimension_numbers<[1], [0], [0], [1], [0, 0, 1, 1], [], []>} : vector<16x8xf32>, vector<8x648xf32>, vector<16x648xf32> -> vector<16x648xf32>
    %104 = arith.addf %99, %103 : vector<16x648xf32>
    %c0_61 = arith.constant 0 : index
    %c0_62 = arith.constant 0 : index
    %105 = vector.load %arg4[%c0_61, %c0_62] : memref<16x1xf32, #tpu.memory_space<vmem>>, vector<16x1xf32>
    %106 = vector.broadcast %105 : vector<16x1xf32> to vector<16x648xf32>
    %107 = arith.addf %104, %106 : vector<16x648xf32>
    %cst_63 = arith.constant 0.000000e+00 : f32
    %108 = vector.broadcast %cst_63 : f32 to vector<16x648xf32>
    %109 = arith.maximumf %107, %108 : vector<16x648xf32>
    %c0_64 = arith.constant 0 : index
    %c0_65 = arith.constant 0 : index
    %110 = vector.load %arg6[%c0_64, %c0_65] : memref<648x2xf32, #tpu.memory_space<vmem>>, vector<648x2xf32>
    %cst_66 = arith.constant dense<0.000000e+00> : vector<16x2xf32>
    %111 = tpu.matmul %109, %110, %cst_66 {dimension_numbers = #tpu.dot_dimension_numbers<[1], [0], [0], [1], [0, 0, 1, 1], [], []>} : vector<16x648xf32>, vector<648x2xf32>, vector<16x2xf32> -> vector<16x2xf32>
    %c0_67 = arith.constant 0 : index
    %c0_68 = arith.constant 0 : index
    %112 = vector.load %arg7[%c0_67, %c0_68] : memref<10x16xf32, #tpu.memory_space<vmem>>, vector<10x16xf32>
    %cst_69 = arith.constant dense<0.000000e+00> : vector<10x2xf32>
    %113 = tpu.matmul %112, %111, %cst_69 {dimension_numbers = #tpu.dot_dimension_numbers<[1], [0], [0], [1], [0, 0, 1, 1], [], []>} : vector<10x16xf32>, vector<16x2xf32>, vector<10x2xf32> -> vector<10x2xf32>
    %c0_70 = arith.constant 0 : index
    %c0_71 = arith.constant 0 : index
    %114 = vector.load %arg8[%c0_70, %c0_71] : memref<10x1xf32, #tpu.memory_space<vmem>>, vector<10x1xf32>
    %115 = vector.broadcast %114 : vector<10x1xf32> to vector<10x2xf32>
    %116 = arith.addf %113, %115 : vector<10x2xf32>
    %c0_72 = arith.constant 0 : index
    %c0_73 = arith.constant 0 : index
    %117 = vector.load %arg9[%c0_72, %c0_73] : memref<10x2xf32, #tpu.memory_space<vmem>>, vector<10x2xf32>
    tpu.vector_store %arg9[%c0_72, %c0_73], %116 {strides = array<i32>} : memref<10x2xf32, #tpu.memory_space<vmem>>, vector<10x2xf32>,
    return
  }
}

</mosaic_0001>

<bundles_post_ra>
// kernel: tile.9
= control target key start
LH: loop header
LB: loop body
LE: loop exit
PB: predicated region body
PF: predicated region fallthrough
CT: control target
= control target key end

     0   :  { %s46_s0 = inlined_call_operand.vmem [shape: f32[324], index: 0, kind: input, shape index: {}]   ;;  %s47_s1 = inlined_call_operand.vmem [shape: f32[2,324], index: 1, kind: output, shape index: {}]  }
   0x1   :  { %v4_v0 = vld [vmem:[%s46_s0] ss:$0 sm:$0xff]  ;;  %v14_v1 = vld [vmem:[%s46_s0 + $0x1] ss:$0 sm:$0xff]  ;;  %v16_v2 = vld [vmem:[%s46_s0 + $0x2] ss:$0 sm:$0xff] }
   0x2   :  { %5 = vst [vmem:[%s47_s1] sm:$0x3] %v4_v0  ;;  %15 = vst [vmem:[%s47_s1 + $0x2] sm:$0x3] %v14_v1 }
   0x3   :  { %17 = vst [vmem:[%s47_s1 + $0x4] sm:$0x3] %v16_v2 }

// kernel: tile.10
= control target key start
LH: loop header
LB: loop body
LE: loop exit
PB: predicated region body
PF: predicated region fallthrough
CT: control target
= control target key end

     0   :  { %vm28_vm0 = vcmask 490496   ;;  %vm18_vm1 = vcmask 556032   ;;  %s39_s12 = smov 3  ;;  %s54_s13 = smov 68   ;;  %vm32_vm2 = vcmask 64512   ;;  %vm35_vm3 = vcmask 1048096   ;;  %s91_s0 = inlined_call_operand.vmem [shape: f32[2,324], index: 0, kind: input, shape index: {}]   ;;  %s92_s1 = inlined_call_operand.vmem [shape: f32[648], index: 1, kind: output, shape index: {}]  }
   0x1   :  { %v47_v0 = vld [vmem:[%s91_s0 + $0x4] sm:$0x3]  ;;  %v48_v1 = vld [vmem:[%s91_s0 + $0x2] sm:$0x3]  ;;  %v14_v2 = vld [vmem:[%s91_s0] sm:$0x3] }
   0x2   :  { %9 = vst [vmem:[#allocation0 + $0x10] sm:$0x3] %v47_v0  ;;  %13 = vst [vmem:[#allocation0 + $0x8] sm:$0x3] %v48_v1  ;;  %s21_s0 = smov 3 }
   0x3   :  { %15 = vst [vmem:[#allocation0] sm:$0x3] %v14_v2 }
   0x9   :  { %v25_v3 = vld [vmem:[#allocation0 + $0x11] sm:$0x1]   ;;  %v17_v7 = vld [vmem:[#allocation0 + $0x10] sm:$0x1]  }
   0xa   :  { %v27_v4 = vld [vmem:[#allocation0 + $0x1] ss:$8 sm:$0x7]   ;;  %v22_v6 = vld [vmem:[#allocation0] ss:$8 sm:%s21_s0]  }
   0xb   :  { %v29_v5 = vsel %vm28_vm0, %v27_v4, %v25_v3  ;;  %23 = vst [vmem:[%s92_s1] sm:$0x3] %v22_v6   ;;  %49 = vst.msk [vmem:[%s92_s1 + $0x2] sm:$0x1] %vm18_vm1, %v17_v7   ;;  %v40_v8 = vld [vmem:[#allocation0 + $0x1] ss:$8 sm:%s39_s12]  }
   0xc   :  { %30 = vrot.lane.b32.xlu0 %v29_v5, %s54_s13 }
  0x10   :  { %41 = vrot.lane.b32.xlu0 %v40_v8, %s54_s13 }
  0x7e   :  { %v31_v9 = vpop.permute.xlu0 %30  }
  0x7f   :  { %50 = vst.msk [vmem:[%s92_s1 + $0x5] sm:$0x1] %vm32_vm2, %v31_v9  }
  0x80   :  { %51 = vst.msk [vmem:[%s92_s1 + $0x2] sm:$0x7] %vm35_vm3, %v31_v9  }
  0x82   :  { %v42_v10 = vpop.permute.xlu0 %41  }
  0x83   :  { %52 = vst.msk [vmem:[%s92_s1 + $0x3] sm:$0x3] %vm18_vm1, %v42_v10  }

// kernel: audio_classification_forward.1
= control target key start
LH: loop header
LB: loop body
LE: loop exit
PB: predicated region body
PF: predicated region fallthrough
CT: control target
= control target key end

     0   :  { %v3577_v0 = vmov 1   ;;  %v3578_v2 = vmov 3   ;;  %v3579_v3 = vmov 2   ;;  %v3580_v4 = vmov 4   ;;  %s3588_s14 = smov 110   ;;  %s3589_s15 = smov 109   ;;  %s4743_s1 = inlined_call_operand.vmem [shape: f32[8,9], index: 1, kind: input, shape index: {}]   ;;  %s4744_s2 = inlined_call_operand.vmem [shape: f32[8,1], index: 2, kind: input, shape index: {}]   ;;  %s4745_s0 = inlined_call_operand.vmem [shape: f32[1,724], index: 0, kind: input, shape index: {}]   ;;  %s4746_s5 = inlined_call_operand.vmem [shape: f32[1,686], index: 5, kind: input, shape index: {}]   ;;  %s4747_s3 = inlined_call_operand.vmem [shape: f32[9,16,8], index: 3, kind: input, shape index: {}]   ;;  %s4748_s4 = inlined_call_operand.vmem [shape: f32[16,1], index: 4, kind: input, shape index: {}]   ;;  %s4749_s8 = inlined_call_operand.vmem [shape: f32[10,1], index: 8, kind: input, shape index: {}]   ;;  %s4750_s6 = inlined_call_operand.vmem [shape: f32[648,2], index: 6, kind: input, shape index: {}]   ;;  %s4751_s7 = inlined_call_operand.vmem [shape: f32[10,16], index: 7, kind: input, shape index: {}]   ;;  %s4752_s9 = inlined_call_operand.vmem [shape: f32[10,2], index: 9, kind: output, shape index: {}]  }
   0x1   :  { %3567 = vset.pattern.permute.xlu0 %v3577_v0  ;;  %v32_v1 = vld [vmem:[%s4743_s1] sm:$0xff]  ;;  %3569 = vset.pattern.permute.xlu1 %v3578_v2  ;;  %v3581_v5 = vmov 5   ;;  %v3582_v6 = vmov 6   ;;  %v3583_v7 = vmov 7   ;;  %v3584_v8 = vmov 0   ;;  %s3590_s16 = smov 108  }
   0x2   :  { %77 = vperm.xlu0 %3567, %v32_v1   ;;  %169 = vperm.xlu1 %3569, %v32_v1   ;;  %v3585_v9 = vmov 8   ;;  %v444_v10 = vld [vmem:[%s4744_s2] sm:$0xff]  ;;  %v40_v11 = vlaneseq  ;;  %s3587_s2 = smov 126   ;;  %s3591_s17 = smov 92   ;;  %vm104_vm0 = vcmask 1039360   ;;  %vm150_vm1 = vcmask 1031168  }
   0x3   :  { %v33_v15 = vld [vmem:[%s4745_s0] sm:$0x3f]  ;;  %s3586_s0 = smov 127   ;;  %s3592_s18 = smov 91   ;;  %vm196_vm2 = vcmask 900096   ;;  %vm242_vm3 = vcmask 891904  }
   0x4   :  { %v3651_v12 = vshrl.u32 %v40_v11, 7  ;;  %s3593_s19 = smov 90   ;;  %vm288_vm4 = vcmask 883712   ;;  %vm334_vm5 = vcmask 752640   ;;  %vm380_vm6 = vcmask 744448  }
   0x5   :  { %vm426_vm7 = vcmask 736256   ;;  %vm534_vm8 = vcmask 64512   ;;  %vm3296_vm9 = vcmask 130048   ;;  %vm3380_vm10 = vcmask 9216  }
   0x6   :  { %3568 = vset.pattern.permute.xlu0 %v3579_v3  ;;  %3570 = vset.pattern.permute.xlu1 %v3580_v4  ;;  %v54_v13 = vsub.s32 3, %v3651_v12  ;;  %v46_v14 = vsub.s32 1, %v3651_v12  ;;  %v50_v18 = vsub.s32 2, %v3651_v12  ;;  %v42_v23 = vsub.s32 0, %v3651_v12 }
   0x7   :  { %123 = vperm.xlu0 %3568, %v32_v1   ;;  %215 = vperm.xlu1 %3570, %v32_v1   ;;  %v58_v38 = vsub.s32 4, %v3651_v12  ;;  %v62_v44 = vsub.s32 5, %v3651_v12  ;;  %v2934_v12 = vld [vmem:[%s4748_s4] sm:$0xff]  ;;  %vm3378_vm11 = vcmask 15360  }
   0x8   :  { %v3660_v16 = vrot.slane %v33_v15, %v54_v13  ;;  %v3664_v17 = vrot.slane %v33_v15, %v46_v14  ;;  %v3671_v22 = vrot.slane %v33_v15, %v50_v18  ;;  %v3679_v26 = vrot.slane %v33_v15, %v42_v23 }
   0x9   :  { %v3715_v41 = vrot.slane %v33_v15, %v58_v38  ;;  %v3730_v48 = vrot.slane %v33_v15, %v62_v44 }
   0xb   :  { %3571 = vset.pattern.permute.xlu1 %v3581_v5  ;;  %3572 = vset.pattern.permute.xlu0 %v3582_v6 }
   0xc   :  { %261 = vperm.xlu1 %3571, %v32_v1   ;;  %307 = vperm.xlu0 %3572, %v32_v1  }
  0x10   :  { %3573 = vset.pattern.permute.xlu1 %v3583_v7  ;;  %3575 = vset.pattern.permute.xlu0 %v3584_v8 }
  0x11   :  { %353 = vperm.xlu1 %3573, %v32_v1   ;;  %36 = vperm.xlu0 %3575, %v32_v1  }
  0x15   :  { %3574 = vset.pattern.permute.xlu1 %v3585_v9 }
  0x16   :  { %399 = vperm.xlu1 %3574, %v32_v1  }
  0x1a   :  { %3576 = vset.pattern.permute.xlu1 %v3584_v8 }
  0x1b   :  { %447 = vperm.xlu1 %3576, %v444_v10  }
  0x7d   :  { %v78_v19 = vpop.permute.xlu0 %77  ;;  %v3685_v29 = vpop.permute.xlu1 %169 }
  0x7e   :  { %v83_v20 = vmul.f32 %v78_v19, %v3660_v16  ;;  %v81_v21 = vmul.f32 %v78_v19, %v3664_v17  ;;  %v82_v25 = vmul.f32 %v78_v19, %v3671_v22  ;;  %v80_v28 = vmul.f32 %v78_v19, %v3679_v26 }
  0x7f   :  { %v173_v31 = vmul.f32 %v3685_v29, %v3664_v17  ;;  %v175_v35 = vmul.f32 %v3685_v29, %v3660_v16  ;;  %v174_v37 = vmul.f32 %v3685_v29, %v3671_v22  ;;  %v172_v39 = vmul.f32 %v3685_v29, %v3679_v26 }
  0x80   :  { %98 = vrot.lane.b32.xlu0 %v83_v20, %s3586_s0  ;;  %94 = vrot.lane.b32.xlu1 %v81_v21, %s3586_s0  ;;  %v84_v45 = vmul.f32 %v78_v19, %v3715_v41  ;;  %v85_v49 = vmul.f32 %v78_v19, %v3730_v48  ;;  %v176_v60 = vmul.f32 %v3685_v29, %v3715_v41 }
  0x81   :  { %v177_v63 = vmul.f32 %v3685_v29, %v3730_v48 }
  0x82   :  { %v124_v24 = vpop.permute.xlu0 %123  ;;  %v3696_v34 = vpop.permute.xlu1 %215 }
  0x83   :  { %v127_v27 = vmul.f32 %v124_v24, %v3664_v17  ;;  %v129_v30 = vmul.f32 %v124_v24, %v3660_v16  ;;  %v128_v32 = vmul.f32 %v124_v24, %v3671_v22  ;;  %v126_v33 = vmul.f32 %v124_v24, %v3679_v26 }
  0x84   :  { %96 = vrot.lane.b32.xlu1 %v82_v25, %s3586_s0  ;;  %v219_v36 = vmul.f32 %v3696_v34, %v3664_v17  ;;  %v221_v40 = vmul.f32 %v3696_v34, %v3660_v16  ;;  %v220_v42 = vmul.f32 %v3696_v34, %v3671_v22  ;;  %v218_v47 = vmul.f32 %v3696_v34, %v3679_v26 }
  0x85   :  { %140 = vrot.lane.b32.xlu0 %v127_v27, %s3587_s2  ;;  %v130_v53 = vmul.f32 %v124_v24, %v3715_v41  ;;  %v131_v56 = vmul.f32 %v124_v24, %v3730_v48  ;;  %v222_v4 = vmul.f32 %v3696_v34, %v3715_v41  ;;  %v223_v5 = vmul.f32 %v3696_v34, %v3730_v48 }
  0x86   :  { %v4753_v24 = vmov 0.0  }
  0x87   :  { %v262_v43 = vpop.permute.xlu1 %261  ;;  %v308_v52 = vpop.permute.xlu0 %307  ;;  %848 = vmatprep.mubr.f32.mxu1 %v4753_v24  ;;  %605 = vmatprep.mubr.f32.mxu0 %v4753_v24 }
  0x88   :  { %92 = vrot.lane.b32.xlu1 %v80_v28, %s3586_s0  ;;  %v265_v46 = vmul.f32 %v262_v43, %v3664_v17  ;;  %v267_v50 = vmul.f32 %v262_v43, %v3660_v16  ;;  %v266_v51 = vmul.f32 %v262_v43, %v3671_v22  ;;  %v311_v54 = vmul.f32 %v308_v52, %v3664_v17 }
  0x89   :  { %144 = vrot.lane.b32.xlu0 %v129_v30, %s3587_s2  ;;  %v264_v55 = vmul.f32 %v262_v43, %v3679_v26  ;;  %v313_v57 = vmul.f32 %v308_v52, %v3660_v16  ;;  %v312_v58 = vmul.f32 %v308_v52, %v3671_v22  ;;  %v310_v62 = vmul.f32 %v308_v52, %v3679_v26 }
  0x8a   :  { %v268_v10 = vmul.f32 %v262_v43, %v3715_v41  ;;  %v269_v11 = vmul.f32 %v262_v43, %v3730_v48  ;;  %v314_v15 = vmul.f32 %v308_v52, %v3715_v41  ;;  %v315_v19 = vmul.f32 %v308_v52, %v3730_v48 }
  0x8c   :  { %142 = vrot.lane.b32.xlu1 %v128_v32, %s3587_s2  ;;  %v354_v59 = vpop.permute.xlu1 %353  ;;  %v3802_v29 = vpop.permute.xlu0 %36 }
  0x8d   :  { %186 = vrot.lane.b32.xlu0 %v173_v31, %s3588_s14  ;;  %v357_v61 = vmul.f32 %v354_v59, %v3664_v17  ;;  %v359_v0 = vmul.f32 %v354_v59, %v3660_v16  ;;  %v358_v1 = vmul.f32 %v354_v59, %v3671_v22  ;;  %v356_v2 = vmul.f32 %v354_v59, %v3679_v26 }
  0x8e   :  { %v360_v20 = vmul.f32 %v354_v59, %v3715_v41  ;;  %v361_v21 = vmul.f32 %v354_v59, %v3730_v48 }
  0x90   :  { %138 = vrot.lane.b32.xlu1 %v126_v33, %s3587_s2 }
  0x91   :  { %190 = vrot.lane.b32.xlu0 %v175_v35, %s3588_s14  ;;  %v400_v3 = vpop.permute.xlu1 %399 }
  0x92   :  { %v403_v6 = vmul.f32 %v400_v3, %v3664_v17  ;;  %v404_v7 = vmul.f32 %v400_v3, %v3671_v22  ;;  %v405_v8 = vmul.f32 %v400_v3, %v3660_v16  ;;  %v402_v9 = vmul.f32 %v400_v3, %v3679_v26 }
  0x93   :  { %v406_v25 = vmul.f32 %v400_v3, %v3715_v41  ;;  %v407_v27 = vmul.f32 %v400_v3, %v3730_v48 }
  0x94   :  { %188 = vrot.lane.b32.xlu1 %v174_v37, %s3588_s14 }
  0x95   :  { %232 = vrot.lane.b32.xlu0 %v219_v36, %s3589_s15 }
  0x96   :  { %v3800_v28 = vpop.permute.xlu1 %447 }
  0x98   :  { %184 = vrot.lane.b32.xlu1 %v172_v39, %s3588_s14 }
  0x99   :  { %236 = vrot.lane.b32.xlu0 %v221_v40, %s3589_s15 }
  0x9c   :  { %234 = vrot.lane.b32.xlu1 %v220_v42, %s3589_s15 }
  0x9d   :  { %100 = vrot.lane.b32.xlu0 %v84_v45, %s3586_s0 }
  0xa0   :  { %230 = vrot.lane.b32.xlu1 %v218_v47, %s3589_s15 }
  0xa1   :  { %278 = vrot.lane.b32.xlu0 %v265_v46, %s3590_s16 }
  0xa4   :  { %102 = vrot.lane.b32.xlu1 %v85_v49, %s3586_s0 }
  0xa5   :  { %282 = vrot.lane.b32.xlu0 %v267_v50, %s3590_s16 }
  0xa8   :  { %280 = vrot.lane.b32.xlu1 %v266_v51, %s3590_s16 }
  0xa9   :  { %146 = vrot.lane.b32.xlu0 %v130_v53, %s3587_s2 }
  0xac   :  { %276 = vrot.lane.b32.xlu1 %v264_v55, %s3590_s16  ;;  %v73_v55 = vmul.f32 %v3660_v16, %v3802_v29 }
  0xad   :  { %324 = vrot.lane.b32.xlu0 %v311_v54, %s3591_s17 }
  0xb0   :  { %148 = vrot.lane.b32.xlu1 %v131_v56, %s3587_s2 }
  0xb1   :  { %328 = vrot.lane.b32.xlu0 %v313_v57, %s3591_s17 }
  0xb4   :  { %326 = vrot.lane.b32.xlu1 %v312_v58, %s3591_s17 }
  0xb5   :  { %192 = vrot.lane.b32.xlu0 %v176_v60, %s3588_s14 }
  0xb8   :  { %322 = vrot.lane.b32.xlu1 %v310_v62, %s3591_s17 }
  0xb9   :  { %370 = vrot.lane.b32.xlu0 %v357_v61, %s3592_s18 }
  0xbc   :  { %194 = vrot.lane.b32.xlu1 %v177_v63, %s3588_s14 }
  0xbd   :  { %374 = vrot.lane.b32.xlu0 %v359_v0, %s3592_s18 }
  0xc0   :  { %372 = vrot.lane.b32.xlu1 %v358_v1, %s3592_s18 }
  0xc1   :  { %368 = vrot.lane.b32.xlu0 %v356_v2, %s3592_s18 }
  0xc4   :  { %238 = vrot.lane.b32.xlu1 %v222_v4, %s3589_s15 }
  0xc5   :  { %240 = vrot.lane.b32.xlu0 %v223_v5, %s3589_s15 }
  0xc8   :  { %416 = vrot.lane.b32.xlu1 %v403_v6, %s3593_s19 }
  0xc9   :  { %418 = vrot.lane.b32.xlu0 %v404_v7, %s3593_s19  ;;  %v71_v7 = vmul.f32 %v3664_v17, %v3802_v29  ;;  %v70_v17 = vmul.f32 %v3679_v26, %v3802_v29 }
  0xcc   :  { %420 = vrot.lane.b32.xlu1 %v405_v8, %s3593_s19 }
  0xcd   :  { %414 = vrot.lane.b32.xlu0 %v402_v9, %s3593_s19 }
  0xd0   :  { %284 = vrot.lane.b32.xlu1 %v268_v10, %s3590_s16 }
  0xd1   :  { %286 = vrot.lane.b32.xlu0 %v269_v11, %s3590_s16 }
  0xd4   :  { %330 = vrot.lane.b32.xlu1 %v314_v15, %s3591_s17 }
  0xd5   :  { %332 = vrot.lane.b32.xlu0 %v315_v19, %s3591_s17  ;;  %v72_v19 = vmul.f32 %v3671_v22, %v3802_v29 }
  0xd8   :  { %376 = vrot.lane.b32.xlu1 %v360_v20, %s3592_s18 }
  0xd9   :  { %378 = vrot.lane.b32.xlu0 %v361_v21, %s3592_s18 }
  0xdc   :  { %422 = vrot.lane.b32.xlu1 %v406_v25, %s3593_s19 }
  0xdd   :  { %424 = vrot.lane.b32.xlu0 %v407_v27, %s3593_s19 }
  0xf2   :  { %v99_v30 = vpop.permute.xlu0 %98  ;;  %v95_v31 = vpop.permute.xlu1 %94 }
  0xf6   :  { %v97_v32 = vpop.permute.xlu1 %96 }
  0xf7   :  { %v141_v33 = vpop.permute.xlu0 %140  ;;  %v106_v6 = vsel %vm104_vm0, %v95_v31, %v97_v32  ;;  %v107_v10 = vsel %vm104_vm0, %v97_v32, %v99_v30 }
  0xf8   :  { %v117_v11 = vadd.f32 %v106_v6, %v71_v7 }
  0xfa   :  { %v93_v34 = vpop.permute.xlu1 %92 }
  0xfb   :  { %v145_v35 = vpop.permute.xlu0 %144  ;;  %v105_v20 = vsel %vm104_vm0, %v93_v34, %v95_v31 }
  0xfe   :  { %v143_v36 = vpop.permute.xlu1 %142 }
  0xff   :  { %v187_v37 = vpop.permute.xlu0 %186  ;;  %v152_v8 = vsel %vm150_vm1, %v141_v33, %v143_v36  ;;  %v153_v25 = vsel %vm150_vm1, %v143_v36, %v145_v35 }
 0x100   :  { %v163_v27 = vadd.f32 %v152_v8, %v117_v11 }
 0x102   :  { %v139_v39 = vpop.permute.xlu1 %138 }
 0x103   :  { %v191_v40 = vpop.permute.xlu0 %190 }
 0x106   :  { %v189_v42 = vpop.permute.xlu1 %188 }
 0x107   :  { %v233_v43 = vpop.permute.xlu0 %232  ;;  %v198_v21 = vsel %vm196_vm2, %v187_v37, %v189_v42  ;;  %v199_v22 = vsel %vm196_vm2, %v189_v42, %v191_v40 }
 0x10a   :  { %v185_v45 = vpop.permute.xlu1 %184 }
 0x10b   :  { %v3804_v46 = vpop.permute.xlu0 %236 }
 0x10e   :  { %v235_v47 = vpop.permute.xlu1 %234 }
 0x10f   :  { %v3806_v49 = vpop.permute.xlu0 %100  ;;  %v244_v32 = vsel %vm242_vm3, %v233_v43, %v235_v47  ;;  %v245_v36 = vsel %vm242_vm3, %v235_v47, %v3804_v46 }
 0x110   :  { %v108_v54 = vsel %vm104_vm0, %v99_v30, %v3806_v49  ;;  %v151_v30 = vsel %vm150_vm1, %v139_v39, %v141_v33 }
 0x111   :  { %v119_v57 = vadd.f32 %v108_v54, %v73_v55  ;;  %v118_v54 = vadd.f32 %v107_v10, %v72_v19 }
 0x112   :  { %v231_v50 = vpop.permute.xlu1 %230 }
 0x113   :  { %v3808_v51 = vpop.permute.xlu0 %278  ;;  %v164_v34 = vadd.f32 %v153_v25, %v118_v54 }
 0x115   :  { %v210_v39 = vadd.f32 %v199_v22, %v164_v34 }
 0x116   :  { %v3810_v52 = vpop.permute.xlu1 %102 }
 0x117   :  { %v3812_v53 = vpop.permute.xlu0 %282  ;;  %v256_v8 = vadd.f32 %v245_v36, %v210_v39  ;;  %v109_v34 = vsel %vm104_vm0, %v3806_v49, %v3810_v52 }
 0x11a   :  { %v281_v56 = vpop.permute.xlu1 %280 }
 0x11b   :  { %v3818_v58 = vpop.permute.xlu0 %146  ;;  %v290_v26 = vsel %vm288_vm4, %v3808_v51, %v281_v56  ;;  %v291_v7 = vsel %vm288_vm4, %v281_v56, %v3812_v53 }
 0x11c   :  { %v154_v59 = vsel %vm150_vm1, %v145_v35, %v3818_v58  ;;  %v302_v19 = vadd.f32 %v291_v7, %v256_v8 }
 0x11d   :  { %v165_v60 = vadd.f32 %v154_v59, %v119_v57  ;;  %v116_v57 = vadd.f32 %v105_v20, %v70_v17  ;;  %v209_v59 = vadd.f32 %v198_v21, %v163_v27 }
 0x11e   :  { %v277_v61 = vpop.permute.xlu1 %276 }
 0x11f   :  { %v325_v62 = vpop.permute.xlu0 %324  ;;  %v162_v35 = vadd.f32 %v151_v30, %v116_v57  ;;  %v255_v33 = vadd.f32 %v244_v32, %v209_v59  ;;  %v289_v10 = vsel %vm288_vm4, %v277_v61, %v3808_v51  ;;  %v3874_v61 = vld [vmem:[%s4746_s5] sm:$0x3f] }
 0x122   :  { %v3822_v63 = vpop.permute.xlu1 %148 }
 0x123   :  { %v3824_v0 = vpop.permute.xlu0 %328  ;;  %v155_v39 = vsel %vm150_vm1, %v3818_v58, %v3822_v63 }
 0x126   :  { %v327_v1 = vpop.permute.xlu1 %326 }
 0x127   :  { %v3826_v2 = vpop.permute.xlu0 %192 }
 0x128   :  { %v200_v16 = vsel %vm196_vm2, %v191_v40, %v3826_v2  ;;  %v336_v40 = vsel %vm334_vm5, %v325_v62, %v327_v1 }
 0x129   :  { %v3830_v3 = vadd.f32 %v200_v16, %v165_v60  ;;  %v197_v60 = vsel %vm196_vm2, %v185_v45, %v187_v37  ;;  %v243_v16 = vsel %vm242_vm3, %v231_v50, %v233_v43  ;;  %v301_v37 = vadd.f32 %v290_v26, %v255_v33 }
 0x12a   :  { %v323_v4 = vpop.permute.xlu1 %322  ;;  %v208_v6 = vadd.f32 %v197_v60, %v162_v35  ;;  %v337_v43 = vsel %vm334_vm5, %v327_v1, %v3824_v0  ;;  %v74_v35 = vmul.f32 %v3715_v41, %v3802_v29  ;;  %v467_v41 = vrot.slane %v3874_v61, %v42_v23 }
 0x12b   :  { %v371_v5 = vpop.permute.xlu0 %370  ;;  %v347_v50 = vadd.f32 %v336_v40, %v301_v37  ;;  %v335_v20 = vsel %vm334_vm5, %v323_v4, %v325_v62  ;;  %v348_v54 = vadd.f32 %v337_v43, %v302_v19  ;;  %v3928_v19 = vld [vmem:[%s4747_s3 + $0x8] sm:$0xff] }
 0x12c   :  { %v254_v11 = vadd.f32 %v243_v16, %v208_v6  ;;  %v120_v40 = vadd.f32 %v109_v34, %v74_v35  ;;  %v487_v35 = vrot.slane %v3874_v61, %v62_v44  ;;  %v3969_v44 = vld [vmem:[%s4747_s3] sm:$0xff] }
 0x12e   :  { %v3836_v9 = vpop.permute.xlu1 %194  ;;  %v300_v56 = vadd.f32 %v289_v10, %v254_v11  ;;  %v166_v37 = vadd.f32 %v155_v39, %v120_v40 }
 0x12f   :  { %v3839_v15 = vpop.permute.xlu0 %374  ;;  %v201_v58 = vsel %vm196_vm2, %v3826_v2, %v3836_v9 }
 0x130   :  { %v346_v30 = vadd.f32 %v335_v20, %v300_v56  ;;  %v212_v2 = vadd.f32 %v201_v58, %v166_v37 }
 0x132   :  { %v373_v55 = vpop.permute.xlu1 %372 }
 0x133   :  { %v369_v31 = vpop.permute.xlu0 %368  ;;  %v382_v47 = vsel %vm380_vm6, %v371_v5, %v373_v55  ;;  %v383_v17 = vsel %vm380_vm6, %v373_v55, %v3839_v15  ;;  %v471_v55 = vrot.slane %v3874_v61, %v46_v14 }
 0x134   :  { %v393_v25 = vadd.f32 %v382_v47, %v347_v50  ;;  %v381_v51 = vsel %vm380_vm6, %v369_v31, %v371_v5  ;;  %v394_v62 = vadd.f32 %v383_v17, %v348_v54  ;;  %v75_v31 = vmul.f32 %v3730_v48, %v3802_v29 }
 0x135   :  { %v392_v57 = vadd.f32 %v381_v51, %v346_v30  ;;  %v475_v48 = vrot.slane %v3874_v61, %v50_v18 }
 0x136   :  { %v239_v42 = vpop.permute.xlu1 %238  ;;  %v121_v33 = vadd.f32 %v3810_v52, %v75_v31 }
 0x137   :  { %v3860_v45 = vpop.permute.xlu0 %240  ;;  %v246_v8 = vsel %vm242_vm3, %v3804_v46, %v239_v42 }
 0x138   :  { %v167_v7 = vadd.f32 %v3822_v63, %v121_v33  ;;  %v247_v63 = vsel %vm242_vm3, %v239_v42, %v3860_v45 }
 0x13a   :  { %v417_v21 = vpop.permute.xlu1 %416  ;;  %v213_v23 = vadd.f32 %v3836_v9, %v167_v7  ;;  %v257_v9 = vadd.f32 %v246_v8, %v3830_v3  ;;  %v3386_v7 = vld [vmem:[%s4747_s3 + $0x10] sm:$0xff] }
 0x13b   :  { %v419_v27 = vpop.permute.xlu0 %418 }
 0x13c   :  { %v428_v1 = vsel %vm426_vm7, %v417_v21, %v419_v27  ;;  %v259_v42 = vadd.f32 %v3860_v45, %v213_v23 }
 0x13d   :  { %v439_v32 = vadd.f32 %v428_v1, %v393_v25 }
 0x13e   :  { %v3877_v4 = vpop.permute.xlu1 %420 }
 0x13f   :  { %v451_v22 = vadd.f32 %v3800_v28, %v439_v32  ;;  %v429_v5 = vsel %vm426_vm7, %v419_v27, %v3877_v4  ;;  %v415_v59 = vpop.permute.xlu0 %414 }
 0x140   :  { %v440_v60 = vadd.f32 %v429_v5, %v394_v62  ;;  %v427_v26 = vsel %vm426_vm7, %v415_v59, %v417_v21  ;;  %v258_v21 = vadd.f32 %v247_v63, %v212_v2 }
 0x141   :  { %v457_v14 = vmax.f32 %v451_v22, 0.0  ;;  %v438_v36 = vadd.f32 %v427_v26, %v392_v57 }
 0x142   :  { %v452_v49 = vadd.f32 %v3800_v28, %v440_v60  ;;  %v285_v16 = vpop.permute.xlu1 %284  ;;  %v479_v60 = vrot.slane %v3874_v61, %v54_v13 }
 0x143   :  { %v3901_v6 = vmul.f32 %v471_v55, %v457_v14  ;;  %v450_v29 = vadd.f32 %v3800_v28, %v438_v36  ;;  %v287_v52 = vpop.permute.xlu0 %286  ;;  %v292_v46 = vsel %vm288_vm4, %v3812_v53, %v285_v16 }
 0x144   :  { %v458_v18 = vmax.f32 %v452_v49, 0.0  ;;  %v293_v20 = vsel %vm288_vm4, %v285_v16, %v287_v52  ;;  %v303_v56 = vadd.f32 %v292_v46, %v257_v9  ;;  %v305_v17 = vadd.f32 %v287_v52, %v259_v42 }
 0x145   :  { %v456_v10 = vmax.f32 %v450_v29, 0.0  ;;  %513 = vrot.lane.b32.xlu1 %v3901_v6, %s3586_s0  ;;  %3547 = vmatprep.subr.mxu1 %v3901_v6  ;;  %v304_v45 = vadd.f32 %v293_v20, %v258_v21 }
 0x146   :  { %v3919_v47 = vmul.f32 %v475_v48, %v458_v18  ;;  %v331_v11 = vpop.permute.xlu1 %330  ;;  %v3387_v18 = vld [vmem:[%s4747_s3 + $0x18] sm:$0xff] }
 0x147   :  { %v3921_v43 = vmul.f32 %v467_v41, %v456_v10  ;;  %v333_v50 = vpop.permute.xlu0 %332  ;;  %v338_v53 = vsel %vm334_vm5, %v3824_v0, %v331_v11 }
 0x148   :  { %515 = vrot.lane.b32.xlu0 %v3919_v47, %s3586_s0  ;;  %v339_v3 = vsel %vm334_vm5, %v331_v11, %v333_v50  ;;  %v349_v0 = vadd.f32 %v338_v53, %v303_v56  ;;  %v351_v51 = vadd.f32 %v333_v50, %v305_v17  ;;  %v3400_v56 = vld [vmem:[%s4747_s3 + $0x20] sm:$0xff] }
 0x149   :  { %511 = vrot.lane.b32.xlu1 %v3921_v43, %s3586_s0  ;;  %3548 = vmatpush1.msra.mxu1 %v3921_v43  ;;  %v350_v30 = vadd.f32 %v339_v3, %v304_v45  ;;  %v3401_v3 = vld [vmem:[%s4747_s3 + $0x28] sm:$0xff] }
 0x14a   :  { %v377_v25 = vpop.permute.xlu1 %376  ;;  %3395 = vmatmul.mubr.msk.f32.vlgmr.msra.gmra.mxu1 %vm534_vm8, %v3928_v19 }
 0x14b   :  { %v384_v27 = vsel %vm380_vm6, %v3839_v15, %v377_v25  ;;  %v379_v54 = vpop.permute.xlu0 %378  ;;  %996 = vmatprep.mubr.f32.mxu1 %v4753_v24 }
 0x14c   :  { %v385_v1 = vsel %vm380_vm6, %v377_v25, %v379_v54  ;;  %v395_v32 = vadd.f32 %v384_v27, %v349_v0  ;;  %v397_v62 = vadd.f32 %v379_v54, %v351_v51 }
 0x14d   :  { %v396_v55 = vadd.f32 %v385_v1, %v350_v30 }
 0x14e   :  { %v423_v57 = vpop.permute.xlu1 %422 }
 0x14f   :  { %v430_v22 = vsel %vm426_vm7, %v3877_v4, %v423_v57  ;;  %v425_v5 = vpop.permute.xlu0 %424  ;;  %v483_v4 = vrot.slane %v3874_v61, %v58_v38  ;;  %v2935_v38 = vld [vmem:[%s4748_s4 + $0x8] sm:$0xff] }
 0x150   :  { %v441_v59 = vadd.f32 %v430_v22, %v395_v32  ;;  %v431_v31 = vsel %vm426_vm7, %v423_v57, %v425_v5  ;;  %v443_v15 = vadd.f32 %v425_v5, %v397_v62  ;;  %v3285_v61 = vld [vmem:[%s4749_s8 + $0x8] sm:$0x3]  ;;  %v3409_v32 = vld [vmem:[%s4747_s3 + $0x38] sm:$0xff] }
 0x151   :  { %v442_v34 = vadd.f32 %v431_v31, %v396_v55 }
 0x152   :  { %v453_v26 = vadd.f32 %v3800_v28, %v441_v59  ;;  %v455_v14 = vadd.f32 %v3800_v28, %v443_v15 }
 0x153   :  { %v454_v36 = vadd.f32 %v3800_v28, %v442_v34  ;;  %v3284_v28 = vld [vmem:[%s4749_s8] sm:$0xff] }
 0x154   :  { %v459_v33 = vmax.f32 %v453_v26, 0.0  ;;  %v461_v39 = vmax.f32 %v455_v14, 0.0 }
 0x155   :  { %v460_v48 = vmax.f32 %v454_v36, 0.0 }
 0x156   :  { %v3962_v49 = vmul.f32 %v479_v60, %v459_v33  ;;  %v499_v13 = vmul.f32 %v487_v35, %v461_v39  ;;  %v3416_v35 = vld [vmem:[%s4747_s3 + $0x40] sm:$0xff]  ;;  %v3417_v33 = vld [vmem:[%s4747_s3 + $0x48] sm:$0xff] }
 0x157   :  { %v498_v16 = vmul.f32 %v483_v4, %v460_v48 }
 0x158   :  { %517 = vrot.lane.b32.xlu0 %v3962_v49, %s3586_s0  ;;  %962 = vmatprep.subr.mxu1 %v499_v13 }
 0x159   :  { %519 = vrot.lane.b32.xlu1 %v498_v16, %s3586_s0  ;;  %963 = vmatpush1.msra.mxu1 %v498_v16 }
 0x15a   :  { %3398 = vmatmul.mubr.msk.f32.vlgmr.msra.gmra.mxu1 %vm534_vm8, %v3969_v44 }
 0x15b   :  { %1002 = vmatprep.mubr.f32.mxu1 %v4753_v24 }
 0x15c   :  { %521 = vrot.lane.b32.xlu0 %v499_v13, %s3586_s0 }
 0x15d   :  { %1014 = vrot.lane.b32.xlu1 %v3901_v6, %s3587_s2 }
 0x15e   :  { %3399 = vmatmul.mubr.msk.f32.gmra.mxu1 %vm534_vm8, %v3928_v19 }
 0x15f   :  { %1182 = vmatprep.mubr.f32.mxu1 %v4753_v24 }
 0x160   :  { %1016 = vrot.lane.b32.xlu0 %v3919_v47, %s3587_s2 }
 0x161   :  { %1012 = vrot.lane.b32.xlu1 %v3921_v43, %s3587_s2 }
 0x164   :  { %1020 = vrot.lane.b32.xlu0 %v498_v16, %s3587_s2 }
 0x165   :  { %1022 = vrot.lane.b32.xlu1 %v499_v13, %s3587_s2 }
 0x168   :  { %1018 = vrot.lane.b32.xlu0 %v3962_v49, %s3587_s2 }
 0x169   :  { %1293 = vrot.lane.b32.xlu1 %v3962_v49, %s3588_s14 }
 0x16c   :  { %1295 = vrot.lane.b32.xlu0 %v498_v16, %s3588_s14 }
 0x16d   :  { %1291 = vrot.lane.b32.xlu1 %v3919_v47, %s3588_s14 }
 0x170   :  { %1289 = vrot.lane.b32.xlu0 %v3901_v6, %s3588_s14 }
 0x171   :  { %1287 = vrot.lane.b32.xlu1 %v3921_v43, %s3588_s14 }
 0x174   :  { %1564 = vrot.lane.b32.xlu0 %v3901_v6, %s3589_s15 }
 0x175   :  { %1566 = vrot.lane.b32.xlu1 %v3919_v47, %s3589_s15 }
 0x178   :  { %1562 = vrot.lane.b32.xlu0 %v3921_v43, %s3589_s15 }
 0x179   :  { %1297 = vrot.lane.b32.xlu1 %v499_v13, %s3588_s14 }
 0x17c   :  { %1570 = vrot.lane.b32.xlu0 %v498_v16, %s3589_s15 }
 0x17d   :  { %1572 = vrot.lane.b32.xlu1 %v499_v13, %s3589_s15 }
 0x180   :  { %1568 = vrot.lane.b32.xlu0 %v3962_v49, %s3589_s15 }
 0x181   :  { %1843 = vrot.lane.b32.xlu1 %v3962_v49, %s3590_s16 }
 0x184   :  { %1845 = vrot.lane.b32.xlu0 %v498_v16, %s3590_s16 }
 0x185   :  { %1841 = vrot.lane.b32.xlu1 %v3919_v47, %s3590_s16 }
 0x188   :  { %1839 = vrot.lane.b32.xlu0 %v3901_v6, %s3590_s16 }
 0x189   :  { %1837 = vrot.lane.b32.xlu1 %v3921_v43, %s3590_s16 }
 0x18c   :  { %2114 = vrot.lane.b32.xlu0 %v3901_v6, %s3591_s17 }
 0x18d   :  { %2116 = vrot.lane.b32.xlu1 %v3919_v47, %s3591_s17 }
 0x190   :  { %2112 = vrot.lane.b32.xlu0 %v3921_v43, %s3591_s17 }
 0x191   :  { %1847 = vrot.lane.b32.xlu1 %v499_v13, %s3590_s16 }
 0x194   :  { %2120 = vrot.lane.b32.xlu0 %v498_v16, %s3591_s17 }
 0x195   :  { %2122 = vrot.lane.b32.xlu1 %v499_v13, %s3591_s17 }
 0x198   :  { %2118 = vrot.lane.b32.xlu0 %v3962_v49, %s3591_s17 }
 0x199   :  { %2393 = vrot.lane.b32.xlu1 %v3962_v49, %s3592_s18 }
 0x19c   :  { %2395 = vrot.lane.b32.xlu0 %v498_v16, %s3592_s18 }
 0x19d   :  { %2391 = vrot.lane.b32.xlu1 %v3919_v47, %s3592_s18 }
 0x1a0   :  { %2389 = vrot.lane.b32.xlu0 %v3901_v6, %s3592_s18 }
 0x1a1   :  { %2387 = vrot.lane.b32.xlu1 %v3921_v43, %s3592_s18 }
 0x1a4   :  { %2664 = vrot.lane.b32.xlu0 %v3901_v6, %s3593_s19 }
 0x1a5   :  { %2666 = vrot.lane.b32.xlu1 %v3919_v47, %s3593_s19 }
 0x1a8   :  { %2662 = vrot.lane.b32.xlu0 %v3921_v43, %s3593_s19 }
 0x1a9   :  { %2397 = vrot.lane.b32.xlu1 %v499_v13, %s3592_s18 }
 0x1ac   :  { %2668 = vrot.lane.b32.xlu0 %v3962_v49, %s3593_s19 }
 0x1ad   :  { %2670 = vrot.lane.b32.xlu1 %v498_v16, %s3593_s19  ;;  %v3424_v16 = vld [vmem:[%s4747_s3 + $0x50] sm:$0xff] }
 0x1b0   :  { %2672 = vrot.lane.b32.xlu0 %v499_v13, %s3593_s19 }
 0x1b1   :  { %2938 = vperm.xlu1 %3576, %v2934_v12  }
 0x1b4   :  { %2943 = vperm.xlu0 %3575, %v2935_v38  }
 0x1b5   :  { %3288 = vperm.xlu1 %3576, %v3284_v28   ;;  %v3425_v28 = vld [vmem:[%s4747_s3 + $0x58] sm:$0xff] }
 0x1b7   :  { %v514_v40 = vpop.permute.xlu1 %513 }
 0x1b8   :  { %3293 = vperm.xlu0 %3575, %v3285_v61  }
 0x1ba   :  { %v516_v41 = vpop.permute.xlu0 %515 }
 0x1bb   :  { %v512_v29 = vpop.permute.xlu1 %511  ;;  %v524_v52 = vsel %vm104_vm0, %v514_v40, %v516_v41 }
 0x1bc   :  { %571 = vmatprep.subr.mxu0 %v524_v52  ;;  %v523_v58 = vsel %vm104_vm0, %v512_v29, %v514_v40 }
 0x1bd   :  { %572 = vmatpush1.msra.mxu0 %v523_v58 }
 0x1be   :  { %3388 = vmatmul.mubr.msk.f32.vlgmr.msra.gmra.mxu0 %vm534_vm8, %v3386_v7 }
 0x1bf   :  { %611 = vmatprep.mubr.f32.mxu0 %v4753_v24 }
 0x1c2   :  { %3389 = vmatmul.mubr.msk.f32.gmra.mxu0 %vm534_vm8, %v3387_v18 }
 0x1c3   :  { %682 = vmatprep.mubr.f32.mxu0 %v4753_v24 }
 0x1ca   :  { %v518_v37 = vpop.permute.xlu0 %517 }
 0x1cb   :  { %v520_v8 = vpop.permute.xlu1 %519  ;;  %v525_v23 = vsel %vm104_vm0, %v516_v41, %v518_v37 }
 0x1cc   :  { %v526_v10 = vsel %vm104_vm0, %v518_v37, %v520_v8 }
 0x1cd   :  { %648 = vmatprep.subr.mxu0 %v526_v10 }
 0x1ce   :  { %v522_v63 = vpop.permute.xlu0 %521  ;;  %649 = vmatpush1.msra.mxu0 %v525_v23 }
 0x1cf   :  { %v527_v11 = vsel %vm104_vm0, %v520_v8, %v522_v63  ;;  %3390 = vmatmul.mubr.msk.f32.vlgmr.msra.gmra.mxu0 %vm534_vm8, %v3386_v7  ;;  %725 = vmatprep.subr.mxu0 %v522_v63  ;;  %v1015_v2 = vpop.permute.xlu1 %1014  ;;  %v3432_v63 = vld [vmem:[%s4747_s3 + $0x60] sm:$0xff] }
 0x1d0   :  { %726 = vmatpush1.msra.mxu0 %v527_v11  ;;  %688 = vmatprep.mubr.f32.mxu0 %v4753_v24 }
 0x1d1   :  { %808 = vmatprep.subr.mxu0 %v3901_v6 }
 0x1d2   :  { %v1017_v46 = vpop.permute.xlu0 %1016 }
 0x1d3   :  { %3391 = vmatmul.mubr.msk.f32.gmra.mxu0 %vm534_vm8, %v3387_v18  ;;  %v1013_v50 = vpop.permute.xlu1 %1012  ;;  %v1025_v25 = vsel %vm150_vm1, %v1015_v2, %v1017_v46 }
 0x1d4   :  { %759 = vmatprep.mubr.f32.mxu0 %v4753_v24  ;;  %v1024_v27 = vsel %vm150_vm1, %v1013_v50, %v1015_v2  ;;  %v3433_v50 = vld [vmem:[%s4747_s3 + $0x68] sm:$0xff] }
 0x1d6   :  { %v1021_v9 = vpop.permute.xlu0 %1020 }
 0x1d7   :  { %3392 = vmatmul.mubr.msk.f32.vlgmr.msra.gmra.mxu0 %vm534_vm8, %v3386_v7  ;;  %v1023_v42 = vpop.permute.xlu1 %1022 }
 0x1d8   :  { %809 = vmatpush1.msra.mxu0 %v3921_v43  ;;  %765 = vmatprep.mubr.f32.mxu0 %v4753_v24  ;;  %v1028_v57 = vsel %vm150_vm1, %v1021_v9, %v1023_v42 }
 0x1d9   :  { %885 = vmatprep.subr.mxu0 %v3962_v49 }
 0x1da   :  { %v1019_v20 = vpop.permute.xlu0 %1018 }
 0x1db   :  { %v1026_v21 = vsel %vm150_vm1, %v1017_v46, %v1019_v20  ;;  %3393 = vmatmul.mubr.msk.f32.gmra.mxu0 %vm534_vm8, %v3387_v18  ;;  %v1294_v6 = vpop.permute.xlu1 %1293  ;;  %v1027_v53 = vsel %vm150_vm1, %v1019_v20, %v1021_v9 }
 0x1dc   :  { %1148 = vmatprep.subr.mxu1 %v1027_v53  ;;  %842 = vmatprep.mubr.f32.mxu0 %v4753_v24 }
 0x1dd   :  { %1149 = vmatpush1.msra.mxu1 %v1026_v21 }
 0x1de   :  { %v1296_v43 = vpop.permute.xlu0 %1295  ;;  %3404 = vmatmul.mubr.msk.f32.vlgmr.msra.gmra.mxu1 %vm534_vm8, %v3400_v56 }
 0x1df   :  { %3394 = vmatmul.mubr.msk.f32.vlgmr.msra.gmra.mxu0 %vm534_vm8, %v3969_v44  ;;  %v1292_v17 = vpop.permute.xlu1 %1291  ;;  %1188 = vmatprep.mubr.f32.mxu1 %v4753_v24  ;;  %v1302_v22 = vsel %vm196_vm2, %v1294_v6, %v1296_v43 }
 0x1e0   :  { %886 = vmatpush1.msra.mxu0 %v3919_v47  ;;  %919 = vmatprep.mubr.f32.mxu0 %v4753_v24  ;;  %v3408_v47 = vld [vmem:[%s4747_s3 + $0x30] sm:$0xff]  ;;  %v1301_v15 = vsel %vm196_vm2, %v1292_v17, %v1294_v6 }
 0x1e1   :  { %1071 = vmatprep.subr.mxu0 %v1025_v25  ;;  %v3440_v6 = vld [vmem:[%s4747_s3 + $0x70] sm:$0xff] }
 0x1e2   :  { %v1290_v45 = vpop.permute.xlu0 %1289  ;;  %3405 = vmatmul.mubr.msk.f32.gmra.mxu1 %vm534_vm8, %v3401_v3 }
 0x1e3   :  { %3396 = vmatmul.mubr.msk.f32.vlgmr.msra.gmra.mxu0 %vm534_vm8, %v3969_v44  ;;  %v1288_v54 = vpop.permute.xlu1 %1287  ;;  %v1300_v0 = vsel %vm196_vm2, %v1290_v45, %v1292_v17  ;;  %1380 = vmatprep.mubr.f32.mxu1 %v4753_v24  ;;  %v3441_v17 = vld [vmem:[%s4747_s3 + $0x78] sm:$0xff] }
 0x1e4   :  { %1072 = vmatpush1.msra.mxu0 %v1024_v27  ;;  %v1299_v51 = vsel %vm196_vm2, %v1288_v54, %v1290_v45  ;;  %1346 = vmatprep.subr.mxu1 %v1300_v0 }
 0x1e5   :  { %1225 = vmatprep.subr.mxu0 %v1023_v42  ;;  %1347 = vmatpush1.msra.mxu1 %v1299_v51 }
 0x1e6   :  { %v1565_v1 = vpop.permute.xlu0 %1564  ;;  %925 = vmatprep.mubr.f32.mxu0 %v4753_v24  ;;  %3410 = vmatmul.mubr.msk.f32.vlgmr.msra.gmra.mxu1 %vm534_vm8, %v3408_v47 }
 0x1e7   :  { %3397 = vmatmul.mubr.msk.f32.gmra.mxu0 %vm534_vm8, %v3928_v19  ;;  %v1567_v30 = vpop.permute.xlu1 %1566  ;;  %1386 = vmatprep.mubr.f32.mxu1 %v4753_v24 }
 0x1e8   :  { %1105 = vmatprep.mubr.f32.mxu0 %v4753_v24  ;;  %v1575_v14 = vsel %vm242_vm3, %v1565_v1, %v1567_v30 }
 0x1ea   :  { %v1563_v62 = vpop.permute.xlu0 %1562  ;;  %3411 = vmatmul.mubr.msk.f32.gmra.mxu1 %vm534_vm8, %v3409_v32 }
 0x1eb   :  { %3402 = vmatmul.mubr.msk.f32.vlgmr.msra.gmra.mxu0 %vm534_vm8, %v3400_v56  ;;  %v1298_v55 = vpop.permute.xlu1 %1297  ;;  %1534 = vmatprep.mubr.f32.mxu1 %v4753_v24  ;;  %v1574_v48 = vsel %vm242_vm3, %v1563_v62, %v1565_v1  ;;  %v3448_v62 = vld [vmem:[%s4747_s3 + $0x80] sm:$0xff] }
 0x1ec   :  { %1226 = vmatpush1.msra.mxu0 %v1028_v57  ;;  %v1303_v19 = vsel %vm196_vm2, %v1296_v43, %v1298_v55  ;;  %1500 = vmatprep.subr.mxu1 %v1298_v55  ;;  %v3449_v57 = vld [vmem:[%s4747_s3 + $0x88] sm:$0xff] }
 0x1ed   :  { %1423 = vmatprep.subr.mxu0 %v1302_v22  ;;  %1501 = vmatpush1.msra.mxu1 %v1303_v19 }
 0x1ee   :  { %v1571_v5 = vpop.permute.xlu0 %1570  ;;  %1111 = vmatprep.mubr.f32.mxu0 %v4753_v24  ;;  %3414 = vmatmul.mubr.msk.f32.vlgmr.msra.gmra.mxu1 %vm534_vm8, %v3408_v47 }
 0x1ef   :  { %3403 = vmatmul.mubr.msk.f32.gmra.mxu0 %vm534_vm8, %v3401_v3  ;;  %v1573_v59 = vpop.permute.xlu1 %1572  ;;  %1540 = vmatprep.mubr.f32.mxu1 %v4753_v24 }
 0x1f0   :  { %1259 = vmatprep.mubr.f32.mxu0 %v4753_v24  ;;  %v1578_v40 = vsel %vm242_vm3, %v1571_v5, %v1573_v59 }
 0x1f2   :  { %v1569_v31 = vpop.permute.xlu0 %1568  ;;  %3415 = vmatmul.mubr.msk.f32.gmra.mxu1 %vm534_vm8, %v3409_v32 }
 0x1f3   :  { %v1576_v34 = vsel %vm242_vm3, %v1567_v30, %v1569_v31  ;;  %3406 = vmatmul.mubr.msk.f32.vlgmr.msra.gmra.mxu0 %vm534_vm8, %v3400_v56  ;;  %v1844_v60 = vpop.permute.xlu1 %1843  ;;  %v1577_v26 = vsel %vm242_vm3, %v1569_v31, %v1571_v5  ;;  %1732 = vmatprep.mubr.f32.mxu1 %v4753_v24  ;;  %v3033_v5 = vld [vmem:[%s4750_s6 + $0x1f8] sm:$0xff]  ;;  %v3032_v31 = vld [vmem:[%s4750_s6 + $0x1f0] sm:$0xff] }
 0x1f4   :  { %1424 = vmatpush1.msra.mxu0 %v1301_v15  ;;  %1698 = vmatprep.subr.mxu1 %v1577_v26  ;;  %v3016_v15 = vld [vmem:[%s4750_s6 + $0x170] sm:$0xff]  ;;  %v3015_v26 = vld [vmem:[%s4750_s6 + $0x168] sm:$0xff] }
 0x1f5   :  { %1621 = vmatprep.subr.mxu0 %v1575_v14  ;;  %1699 = vmatpush1.msra.mxu1 %v1576_v34  ;;  %v3031_v34 = vld [vmem:[%s4750_s6 + $0x1e8] sm:$0xff]  ;;  %v3030_v14 = vld [vmem:[%s4750_s6 + $0x1e0] sm:$0xff] }
 0x1f6   :  { %v1846_v4 = vpop.permute.xlu0 %1845  ;;  %1265 = vmatprep.mubr.f32.mxu0 %v4753_v24  ;;  %3420 = vmatmul.mubr.msk.f32.vlgmr.msra.gmra.mxu1 %vm534_vm8, %v3416_v35 }
 0x1f7   :  { %3407 = vmatmul.mubr.msk.f32.gmra.mxu0 %vm534_vm8, %v3401_v3  ;;  %v1842_v36 = vpop.permute.xlu1 %1841  ;;  %1738 = vmatprep.mubr.f32.mxu1 %v4753_v24  ;;  %v1852_v52 = vsel %vm288_vm4, %v1844_v60, %v1846_v4 }
 0x1f8   :  { %1457 = vmatprep.mubr.f32.mxu0 %v4753_v24  ;;  %v1851_v37 = vsel %vm288_vm4, %v1842_v36, %v1844_v60  ;;  %v3001_v60 = vld [vmem:[%s4750_s6 + $0xf8] sm:$0xff] }
 0x1fa   :  { %v1840_v39 = vpop.permute.xlu0 %1839  ;;  %3421 = vmatmul.mubr.msk.f32.gmra.mxu1 %vm534_vm8, %v3417_v33 }
 0x1fb   :  { %3412 = vmatmul.mubr.msk.f32.vlgmr.msra.gmra.mxu0 %vm534_vm8, %v3408_v47  ;;  %v1838_v49 = vpop.permute.xlu1 %1837  ;;  %v1850_v13 = vsel %vm288_vm4, %v1840_v39, %v1842_v36  ;;  %1930 = vmatprep.mubr.f32.mxu1 %v4753_v24  ;;  %v3014_v36 = vld [vmem:[%s4750_s6 + $0x160] sm:$0xff] }
 0x1fc   :  { %1622 = vmatpush1.msra.mxu0 %v1574_v48  ;;  %v1849_v44 = vsel %vm288_vm4, %v1838_v49, %v1840_v39  ;;  %1896 = vmatprep.subr.mxu1 %v1850_v13  ;;  %v3029_v39 = vld [vmem:[%s4750_s6 + $0x1d8] sm:$0xff]  ;;  %v2999_v48 = vld [vmem:[%s4750_s6 + $0xe8] sm:$0xff] }
 0x1fd   :  { %1775 = vmatprep.subr.mxu0 %v1573_v59  ;;  %1897 = vmatpush1.msra.mxu1 %v1849_v44  ;;  %v3017_v59 = vld [vmem:[%s4750_s6 + $0x178] sm:$0xff]  ;;  %v2983_v13 = vld [vmem:[%s4750_s6 + $0x68] sm:$0xff]  ;;  %v2998_v44 = vld [vmem:[%s4750_s6 + $0xe0] sm:$0xff] }
 0x1fe   :  { %v2115_v12 = vpop.permute.xlu0 %2114  ;;  %1463 = vmatprep.mubr.f32.mxu0 %v4753_v24  ;;  %3426 = vmatmul.mubr.msk.f32.vlgmr.msra.gmra.mxu1 %vm534_vm8, %v3424_v16  ;;  %v3013_v49 = vld [vmem:[%s4750_s6 + $0x158] sm:$0xff] }
 0x1ff   :  { %3413 = vmatmul.mubr.msk.f32.gmra.mxu0 %vm534_vm8, %v3409_v32  ;;  %v2117_v38 = vpop.permute.xlu1 %2116  ;;  %1936 = vmatprep.mubr.f32.mxu1 %v4753_v24 }
 0x200   :  { %1655 = vmatprep.mubr.f32.mxu0 %v4753_v24  ;;  %v2125_v11 = vsel %vm334_vm5, %v2115_v12, %v2117_v38 }
 0x202   :  { %v2113_v61 = vpop.permute.xlu0 %2112  ;;  %3427 = vmatmul.mubr.msk.f32.gmra.mxu1 %vm534_vm8, %v3425_v28 }
 0x203   :  { %3418 = vmatmul.mubr.msk.f32.vlgmr.msra.gmra.mxu0 %vm534_vm8, %v3416_v35  ;;  %v1848_v41 = vpop.permute.xlu1 %1847  ;;  %2084 = vmatprep.mubr.f32.mxu1 %v4753_v24  ;;  %v2124_v42 = vsel %vm334_vm5, %v2113_v61, %v2115_v12  ;;  %v3012_v12 = vld [vmem:[%s4750_s6 + $0x150] sm:$0xff]  ;;  %v2997_v61 = vld [vmem:[%s4750_s6 + $0xd8] sm:$0xff] }
 0x204   :  { %1776 = vmatpush1.msra.mxu0 %v1578_v40  ;;  %v1853_v29 = vsel %vm288_vm4, %v1846_v4, %v1848_v41  ;;  %2050 = vmatprep.subr.mxu1 %v1848_v41  ;;  %v3000_v4 = vld [vmem:[%s4750_s6 + $0xf0] sm:$0xff]  ;;  %v3011_v40 = vld [vmem:[%s4750_s6 + $0x148] sm:$0xff]  ;;  %v2981_v41 = vld [vmem:[%s4750_s6 + $0x58] sm:$0xff] }
 0x205   :  { %1973 = vmatprep.subr.mxu0 %v1852_v52  ;;  %2051 = vmatpush1.msra.mxu1 %v1853_v29  ;;  %v3026_v29 = vld [vmem:[%s4750_s6 + $0x1c0] sm:$0xff]  ;;  %v2996_v52 = vld [vmem:[%s4750_s6 + $0xd0] sm:$0xff] }
 0x206   :  { %v2121_v7 = vpop.permute.xlu0 %2120  ;;  %1661 = vmatprep.mubr.f32.mxu0 %v4753_v24  ;;  %3430 = vmatmul.mubr.msk.f32.vlgmr.msra.gmra.mxu1 %vm534_vm8, %v3424_v16 }
 0x207   :  { %3419 = vmatmul.mubr.msk.f32.gmra.mxu0 %vm534_vm8, %v3417_v33  ;;  %v2123_v58 = vpop.permute.xlu1 %2122  ;;  %2090 = vmatprep.mubr.f32.mxu1 %v4753_v24 }
 0x208   :  { %1809 = vmatprep.mubr.f32.mxu0 %v4753_v24  ;;  %v2128_v25 = vsel %vm334_vm5, %v2121_v7, %v2123_v58 }
 0x20a   :  { %v2119_v18 = vpop.permute.xlu0 %2118  ;;  %3431 = vmatmul.mubr.msk.f32.gmra.mxu1 %vm534_vm8, %v3425_v28 }
 0x20b   :  { %v2126_v8 = vsel %vm334_vm5, %v2117_v38, %v2119_v18  ;;  %3422 = vmatmul.mubr.msk.f32.vlgmr.msra.gmra.mxu0 %vm534_vm8, %v3416_v35  ;;  %v2394_v10 = vpop.permute.xlu1 %2393  ;;  %v2127_v23 = vsel %vm334_vm5, %v2119_v18, %v2121_v7  ;;  %2282 = vmatprep.mubr.f32.mxu1 %v4753_v24  ;;  %v2985_v35 = vld [vmem:[%s4750_s6 + $0x78] sm:$0xff]  ;;  %v2982_v38 = vld [vmem:[%s4750_s6 + $0x60] sm:$0xff] }
 0x20c   :  { %1974 = vmatpush1.msra.mxu0 %v1851_v37  ;;  %2248 = vmatprep.subr.mxu1 %v2127_v23  ;;  %v3010_v7 = vld [vmem:[%s4750_s6 + $0x140] sm:$0xff]  ;;  %v3025_v18 = vld [vmem:[%s4750_s6 + $0x1b8] sm:$0xff]  ;;  %v2995_v37 = vld [vmem:[%s4750_s6 + $0xc8] sm:$0xff] }
 0x20d   :  { %2171 = vmatprep.subr.mxu0 %v2125_v11  ;;  %2249 = vmatpush1.msra.mxu1 %v2126_v8  ;;  %v3009_v8 = vld [vmem:[%s4750_s6 + $0x138] sm:$0xff]  ;;  %v3024_v23 = vld [vmem:[%s4750_s6 + $0x1b0] sm:$0xff] }
 0x20e   :  { %v2396_v2 = vpop.permute.xlu0 %2395  ;;  %1815 = vmatprep.mubr.f32.mxu0 %v4753_v24  ;;  %3436 = vmatmul.mubr.msk.f32.vlgmr.msra.gmra.mxu1 %vm534_vm8, %v3432_v63  ;;  %v3008_v11 = vld [vmem:[%s4750_s6 + $0x130] sm:$0xff] }
 0x20f   :  { %3423 = vmatmul.mubr.msk.f32.gmra.mxu0 %vm534_vm8, %v3417_v33  ;;  %v2392_v46 = vpop.permute.xlu1 %2391  ;;  %2288 = vmatprep.mubr.f32.mxu1 %v4753_v24  ;;  %v2402_v54 = vsel %vm380_vm6, %v2394_v10, %v2396_v2  ;;  %v2984_v33 = vld [vmem:[%s4750_s6 + $0x70] sm:$0xff] }
 0x210   :  { %2007 = vmatprep.mubr.f32.mxu0 %v4753_v24  ;;  %v2401_v30 = vsel %vm380_vm6, %v2392_v46, %v2394_v10  ;;  %v2979_v10 = vld [vmem:[%s4750_s6 + $0x48] sm:$0xff] }
 0x212   :  { %v2390_v9 = vpop.permute.xlu0 %2389  ;;  %3437 = vmatmul.mubr.msk.f32.gmra.mxu1 %vm534_vm8, %v3433_v50 }
 0x213   :  { %3428 = vmatmul.mubr.msk.f32.vlgmr.msra.gmra.mxu0 %vm534_vm8, %v3424_v16  ;;  %v2388_v20 = vpop.permute.xlu1 %2387  ;;  %v2400_v21 = vsel %vm380_vm6, %v2390_v9, %v2392_v46  ;;  %2480 = vmatprep.mubr.f32.mxu1 %v4753_v24  ;;  %v3028_v16 = vld [vmem:[%s4750_s6 + $0x1d0] sm:$0xff]  ;;  %v3023_v46 = vld [vmem:[%s4750_s6 + $0x1a8] sm:$0xff] }
 0x214   :  { %2172 = vmatpush1.msra.mxu0 %v2124_v42  ;;  %v2399_v53 = vsel %vm380_vm6, %v2388_v20, %v2390_v9  ;;  %2446 = vmatprep.subr.mxu1 %v2400_v21  ;;  %v3007_v9 = vld [vmem:[%s4750_s6 + $0x128] sm:$0xff]  ;;  %v2977_v42 = vld [vmem:[%s4750_s6 + $0x38] sm:$0xff]  ;;  %v3022_v20 = vld [vmem:[%s4750_s6 + $0x1a0] sm:$0xff] }
 0x215   :  { %2325 = vmatprep.subr.mxu0 %v2123_v58  ;;  %2447 = vmatpush1.msra.mxu1 %v2399_v53  ;;  %v2980_v58 = vld [vmem:[%s4750_s6 + $0x50] sm:$0xff] }
 0x216   :  { %v2665_v56 = vpop.permute.xlu0 %2664  ;;  %2013 = vmatprep.mubr.f32.mxu0 %v4753_v24  ;;  %3442 = vmatmul.mubr.msk.f32.vlgmr.msra.gmra.mxu1 %vm534_vm8, %v3440_v6  ;;  %v2992_v21 = vld [vmem:[%s4750_s6 + $0xb0] sm:$0xff] }
 0x217   :  { %3429 = vmatmul.mubr.msk.f32.gmra.mxu0 %vm534_vm8, %v3425_v28  ;;  %v2667_v43 = vpop.permute.xlu1 %2666  ;;  %2486 = vmatprep.mubr.f32.mxu1 %v4753_v24  ;;  %v3027_v28 = vld [vmem:[%s4750_s6 + $0x1c8] sm:$0xff]  ;;  %v2976_v53 = vld [vmem:[%s4750_s6 + $0x30] sm:$0xff] }
 0x218   :  { %2205 = vmatprep.mubr.f32.mxu0 %v4753_v24  ;;  %v2675_v32 = vsel %vm426_vm7, %v2665_v56, %v2667_v43 }
 0x21a   :  { %v2663_v3 = vpop.permute.xlu0 %2662  ;;  %3443 = vmatmul.mubr.msk.f32.gmra.mxu1 %vm534_vm8, %v3441_v17 }
 0x21b   :  { %3434 = vmatmul.mubr.msk.f32.vlgmr.msra.gmra.mxu0 %vm534_vm8, %v3432_v63  ;;  %v2398_v45 = vpop.permute.xlu1 %2397  ;;  %2634 = vmatprep.mubr.f32.mxu1 %v4753_v24  ;;  %v2674_v55 = vsel %vm426_vm7, %v2663_v3, %v2665_v56  ;;  %v3021_v56 = vld [vmem:[%s4750_s6 + $0x198] sm:$0xff]  ;;  %v2975_v3 = vld [vmem:[%s4750_s6 + $0x28] sm:$0xff] }
 0x21c   :  { %2326 = vmatpush1.msra.mxu0 %v2128_v25  ;;  %v2403_v27 = vsel %vm380_vm6, %v2396_v2, %v2398_v45  ;;  %2600 = vmatprep.subr.mxu1 %v2398_v45  ;;  %v2978_v2 = vld [vmem:[%s4750_s6 + $0x40] sm:$0xff]  ;;  %v3020_v25 = vld [vmem:[%s4750_s6 + $0x190] sm:$0xff] }
 0x21d   :  { %2523 = vmatprep.subr.mxu0 %v2402_v54  ;;  %2601 = vmatpush1.msra.mxu1 %v2403_v27  ;;  %v2990_v45 = vld [vmem:[%s4750_s6 + $0xa0] sm:$0xff]  ;;  %v3004_v27 = vld [vmem:[%s4750_s6 + $0x110] sm:$0xff] }
 0x21e   :  { %v2669_v0 = vpop.permute.xlu0 %2668  ;;  %2211 = vmatprep.mubr.f32.mxu0 %v4753_v24  ;;  %3446 = vmatmul.mubr.msk.f32.vlgmr.msra.gmra.mxu1 %vm534_vm8, %v3440_v6  ;;  %v2974_v54 = vld [vmem:[%s4750_s6 + $0x20] sm:$0xff] }
 0x21f   :  { %3435 = vmatmul.mubr.msk.f32.gmra.mxu0 %vm534_vm8, %v3433_v50  ;;  %v2671_v47 = vpop.permute.xlu1 %2670  ;;  %2640 = vmatprep.mubr.f32.mxu1 %v4753_v24  ;;  %v2676_v1 = vsel %vm426_vm7, %v2667_v43, %v2669_v0  ;;  %v2991_v43 = vld [vmem:[%s4750_s6 + $0xa8] sm:$0xff] }
 0x220   :  { %v2677_v51 = vsel %vm426_vm7, %v2669_v0, %v2671_v47  ;;  %2359 = vmatprep.mubr.f32.mxu0 %v4753_v24  ;;  %v3019_v0 = vld [vmem:[%s4750_s6 + $0x188] sm:$0xff] }
 0x221   :  { %2798 = vmatprep.subr.mxu1 %v2677_v51  ;;  %v3003_v51 = vld [vmem:[%s4750_s6 + $0x108] sm:$0xff] }
 0x222   :  { %2799 = vmatpush1.msra.mxu1 %v2676_v1  ;;  %v2673_v19 = vpop.permute.xlu0 %2672  ;;  %v2973_v1 = vld [vmem:[%s4750_s6 + $0x18] sm:$0xff] }
 0x223   :  { %3438 = vmatmul.mubr.msk.f32.vlgmr.msra.gmra.mxu0 %vm534_vm8, %v3432_v63  ;;  %3447 = vmatmul.mubr.msk.f32.gmra.mxu1 %vm534_vm8, %v3441_v17  ;;  %v2678_v22 = vsel %vm426_vm7, %v2671_v47, %v2673_v19  ;;  %v2994_v63 = vld [vmem:[%s4750_s6 + $0xc0] sm:$0xff]  ;;  %v2989_v47 = vld [vmem:[%s4750_s6 + $0x98] sm:$0xff] }
 0x224   :  { %2524 = vmatpush1.msra.mxu0 %v2401_v30  ;;  %2365 = vmatprep.mubr.f32.mxu0 %v4753_v24  ;;  %v3018_v30 = vld [vmem:[%s4750_s6 + $0x180] sm:$0xff] }
 0x225   :  { %2721 = vmatprep.subr.mxu0 %v2675_v32  ;;  %2832 = vmatprep.mubr.f32.mxu1 %v4753_v24  ;;  %v2988_v32 = vld [vmem:[%s4750_s6 + $0x90] sm:$0xff] }
 0x226   :  { %3460 = vmatprep.subr.mxu1 %v3001_v60 }
 0x227   :  { %3439 = vmatmul.mubr.msk.f32.gmra.mxu0 %vm534_vm8, %v3433_v50  ;;  %3452 = vmatmul.mubr.msk.f32.vlgmr.msra.gmra.mxu1 %vm534_vm8, %v3448_v62  ;;  %v2993_v50 = vld [vmem:[%s4750_s6 + $0xb8] sm:$0xff] }
 0x228   :  { %2557 = vmatprep.mubr.f32.mxu0 %v4753_v24  ;;  %2838 = vmatprep.mubr.f32.mxu1 %v4753_v24 }
 0x229   :  { %3461 = vmatpush3.msra.mxu1 %v2985_v35 }
 0x22a   :  { %3462 = vmatprep.subr.mxu1 %v3000_v4 }
 0x22b   :  { %3444 = vmatmul.mubr.msk.f32.vlgmr.msra.gmra.mxu0 %vm534_vm8, %v3440_v6  ;;  %3453 = vmatmul.mubr.msk.f32.gmra.mxu1 %vm534_vm8, %v3449_v57  ;;  %v3006_v6 = vld [vmem:[%s4750_s6 + $0x120] sm:$0xff] }
 0x22c   :  { %2722 = vmatpush1.msra.mxu0 %v2674_v55  ;;  %2563 = vmatprep.mubr.f32.mxu0 %v4753_v24  ;;  %v2987_v55 = vld [vmem:[%s4750_s6 + $0x88] sm:$0xff] }
 0x22d   :  { %2875 = vmatprep.subr.mxu0 %v2673_v19  ;;  %3463 = vmatpush3.msra.mxu1 %v2984_v33  ;;  %v2971_v19 = vld [vmem:[%s4750_s6 + $0x8] sm:$0xff] }
 0x22e   :  { %3464 = vmatprep.subr.mxu1 %v2999_v48 }
 0x22f   :  { %3445 = vmatmul.mubr.msk.f32.gmra.mxu0 %vm534_vm8, %v3441_v17  ;;  %3465 = vmatpush3.msra.mxu1 %v2983_v13  ;;  %v3005_v17 = vld [vmem:[%s4750_s6 + $0x118] sm:$0xff] }
 0x230   :  { %2755 = vmatprep.mubr.f32.mxu0 %v4753_v24  ;;  %3466 = vmatprep.subr.mxu1 %v2998_v44 }
 0x231   :  { %3467 = vmatpush3.msra.mxu1 %v2982_v38 }
 0x232   :  { %3468 = vmatprep.subr.mxu1 %v2997_v61 }
 0x233   :  { %3450 = vmatmul.mubr.msk.f32.vlgmr.msra.gmra.mxu0 %vm534_vm8, %v3448_v62  ;;  %3469 = vmatpush3.msra.mxu1 %v2981_v41 }
 0x234   :  { %2876 = vmatpush1.msra.mxu0 %v2678_v22  ;;  %2761 = vmatprep.mubr.f32.mxu0 %v4753_v24  ;;  %v2986_v22 = vld [vmem:[%s4750_s6 + $0x80] sm:$0xff] }
 0x235   :  { %3498 = vmatprep.subr.mxu0 %v3033_v5  ;;  %3470 = vmatprep.subr.mxu1 %v2996_v52  ;;  %v2970_v5 = vld [vmem:[%s4750_s6] sm:$0xff] }
 0x236   :  { %3471 = vmatpush3.msra.mxu1 %v2980_v58 }
 0x237   :  { %3451 = vmatmul.mubr.msk.f32.gmra.mxu0 %vm534_vm8, %v3449_v57  ;;  %3472 = vmatprep.subr.mxu1 %v2995_v37 }
 0x238   :  { %2909 = vmatprep.mubr.f32.mxu0 %v4753_v24  ;;  %3473 = vmatpush3.msra.mxu1 %v2979_v10 }
 0x239   :  { %3474 = vmatprep.subr.mxu1 %v2994_v63 }
 0x23a   :  { %3475 = vmatpush3.msra.mxu1 %v2978_v2 }
 0x23b   :  { %3454 = vmatmul.mubr.msk.f32.vlgmr.msra.gmra.mxu0 %vm534_vm8, %v3448_v62  ;;  %3476 = vmatprep.subr.mxu1 %v2993_v50  ;;  %v3002_v62 = vld [vmem:[%s4750_s6 + $0x100] sm:$0xff] }
 0x23c   :  { %2915 = vmatprep.mubr.f32.mxu0 %v4753_v24  ;;  %3499 = vmatpush3.msra.mxu0 %v3017_v59 }
 0x23d   :  { %3500 = vmatprep.subr.mxu0 %v3032_v31  ;;  %3477 = vmatpush3.msra.mxu1 %v2977_v42 }
 0x23e   :  { %3501 = vmatpush3.msra.mxu0 %v3016_v15  ;;  %3478 = vmatprep.subr.mxu1 %v2992_v21 }
 0x23f   :  { %3455 = vmatmul.mubr.msk.f32.gmra.mxu0 %vm534_vm8, %v3449_v57  ;;  %3502 = vmatprep.subr.mxu0 %v3031_v34  ;;  %v2972_v57 = vld [vmem:[%s4750_s6 + $0x10] sm:$0xff]  ;;  %v4451_v34 = vpop.f32.mrf.mxu1 }
 0x240   :  { %3503 = vmatpush3.msra.mxu0 %v3015_v26  ;;  %3479 = vmatpush3.msra.mxu1 %v2976_v53 }
 0x241   :  { %3504 = vmatprep.subr.mxu0 %v3030_v14  ;;  %3480 = vmatprep.subr.mxu1 %v2991_v43  ;;  %v4455_v26 = vpop.f32.mrf.mxu1 }
 0x242   :  { %3505 = vmatpush3.msra.mxu0 %v3014_v36  ;;  %3481 = vmatpush3.msra.mxu1 %v2975_v3 }
 0x243   :  { %3506 = vmatprep.subr.mxu0 %v3029_v39  ;;  %3482 = vmatprep.subr.mxu1 %v2990_v45  ;;  %v998_v14 = vpop.f32.mrf.mxu1 }
 0x244   :  { %3507 = vmatpush3.msra.mxu0 %v3013_v49  ;;  %3483 = vmatpush3.msra.mxu1 %v2974_v54 }
 0x245   :  { %3508 = vmatprep.subr.mxu0 %v3028_v16  ;;  %3484 = vmatprep.subr.mxu1 %v2989_v47  ;;  %v4463_v33 = vpop.f32.mrf.mxu1 }
 0x246   :  { %3509 = vmatpush3.msra.mxu0 %v3012_v12  ;;  %3485 = vmatpush3.msra.mxu1 %v2973_v1 }
 0x247   :  { %3510 = vmatprep.subr.mxu0 %v3027_v28  ;;  %3486 = vmatprep.subr.mxu1 %v2988_v32  ;;  %v1004_v49 = vpop.f32.mrf.mxu1 }
 0x248   :  { %3511 = vmatpush3.msra.mxu0 %v3011_v40  ;;  %3487 = vmatpush3.msra.mxu1 %v2972_v57 }
 0x249   :  { %3512 = vmatprep.subr.mxu0 %v3026_v29  ;;  %3488 = vmatprep.subr.mxu1 %v2987_v55  ;;  %v1006_v44 = vpop.f32.mrf.mxu1 }
 0x24a   :  { %3513 = vmatpush3.msra.mxu0 %v3010_v7  ;;  %3489 = vmatpush3.msra.mxu1 %v2971_v19 }
 0x24b   :  { %3514 = vmatprep.subr.mxu0 %v3025_v18  ;;  %3490 = vmatprep.subr.mxu1 %v2986_v22 }
 0x24c   :  { %3515 = vmatpush3.msra.mxu0 %v3009_v8  ;;  %3491 = vmatpush3.msra.mxu1 %v2970_v5 }
 0x24d   :  { %3516 = vmatprep.subr.mxu0 %v3024_v23  ;;  %3207 = vmatprep.subr.mxu1 %v4753_v24 }
 0x24e   :  { %3517 = vmatpush3.msra.mxu0 %v3008_v11 }
 0x24f   :  { %3518 = vmatprep.subr.mxu0 %v3023_v46 }
 0x250   :  { %3519 = vmatpush3.msra.mxu0 %v3007_v9 }
 0x251   :  { %3520 = vmatprep.subr.mxu0 %v3022_v20 }
 0x252   :  { %3521 = vmatpush3.msra.mxu0 %v3006_v6 }
 0x253   :  { %3522 = vmatprep.subr.mxu0 %v3021_v56 }
 0x254   :  { %3523 = vmatpush3.msra.mxu0 %v3005_v17 }
 0x255   :  { %3524 = vmatprep.subr.mxu0 %v3020_v25 }
 0x256   :  { %3525 = vmatpush3.msra.mxu0 %v3004_v27 }
 0x257   :  { %3526 = vmatprep.subr.mxu0 %v3019_v0 }
 0x258   :  { %3527 = vmatpush3.msra.mxu0 %v3003_v51 }
 0x259   :  { %3528 = vmatprep.subr.mxu0 %v3018_v30 }
 0x25a   :  { %3529 = vmatpush3.msra.mxu0 %v3002_v62 }
 0x27e   :  { %v607_v59 = vpop.f32.mrf.mxu0 }
 0x280   :  { %v609_v31 = vpop.f32.mrf.mxu0 }
 0x282   :  { %v4449_v15 = vpop.f32.mrf.mxu0 }
 0x284   :  { %v4453_v60 = vpop.f32.mrf.mxu0 }
 0x28f   :  { %v4457_v35 = vpop.f32.mrf.mxu0 }
 0x291   :  { %v4459_v4 = vpop.f32.mrf.mxu0 }
 0x293   :  { %v4461_v36 = vpop.f32.mrf.mxu0 }
 0x295   :  { %v4465_v39 = vpop.f32.mrf.mxu0 }
 0x297   :  { %v761_v48 = vpop.f32.mrf.mxu0 }
 0x298   :  { %v999_v6 = vadd.f32 %v998_v14, %v761_v48 }
 0x299   :  { %v4467_v13 = vpop.f32.mrf.mxu0 }
 0x29b   :  { %v767_v16 = vpop.f32.mrf.mxu0 }
 0x29c   :  { %v1005_v25 = vadd.f32 %v1004_v49, %v767_v16 }
 0x29d   :  { %v769_v12 = vpop.f32.mrf.mxu0 }
 0x29e   :  { %v1007_v38 = vadd.f32 %v1006_v44, %v769_v12  ;;  %v4469_v28 = vpop.f32.mrf.mxu1 }
 0x29f   :  { %v844_v61 = vpop.f32.mrf.mxu0 }
 0x2a0   :  { %v4471_v40 = vadd.f32 %v844_v61, %v607_v59  ;;  %v4473_v41 = vpop.f32.mrf.mxu1 }
 0x2a1   :  { %v846_v29 = vpop.f32.mrf.mxu0 }
 0x2a2   :  { %v4475_v52 = vadd.f32 %v846_v29, %v609_v31  ;;  %v4477_v7 = vpop.f32.mrf.mxu1 }
 0x2a3   :  { %v4479_v58 = vpop.f32.mrf.mxu0 }
 0x2a4   :  { %v4481_v18 = vpop.f32.mrf.mxu1 }
 0x2a5   :  { %v4483_v37 = vpop.f32.mrf.mxu0 }
 0x2a6   :  { %v4485_v8 = vpop.f32.mrf.mxu1 }
 0x2a7   :  { %v4487_v10 = vpop.f32.mrf.mxu0 }
 0x2a8   :  { %v4489_v23 = vpop.f32.mrf.mxu1 }
 0x2a9   :  { %v4491_v63 = vpop.f32.mrf.mxu0 }
 0x2aa   :  { %v4493_v11 = vpop.f32.mrf.mxu1 }
 0x2ab   :  { %v4495_v2 = vpop.f32.mrf.mxu0 }
 0x2ac   :  { %v4497_v46 = vpop.f32.mrf.mxu1 }
 0x2ad   :  { %v4499_v50 = vpop.f32.mrf.mxu0 }
 0x2ae   :  { %v1536_v9 = vpop.f32.mrf.mxu1 }
 0x2af   :  { %v4501_v42 = vpop.f32.mrf.mxu0 }
 0x2b0   :  { %v4503_v20 = vpop.f32.mrf.mxu1 }
 0x2b1   :  { %v4505_v21 = vpop.f32.mrf.mxu0 }
 0x2b2   :  { %v1542_v53 = vpop.f32.mrf.mxu1 }
 0x2b3   :  { %v1261_v56 = vpop.f32.mrf.mxu0 }
 0x2b4   :  { %v1276_v43 = vadd.f32 %v1261_v56, %v999_v6  ;;  %v1544_v17 = vpop.f32.mrf.mxu1 }
 0x2b5   :  { %v4507_v3 = vpop.f32.mrf.mxu0 }
 0x2b6   :  { %v1551_v45 = vadd.f32 %v1536_v9, %v1276_v43  ;;  %v4509_v27 = vpop.f32.mrf.mxu1 }
 0x2b7   :  { %v1267_v54 = vpop.f32.mrf.mxu0 }
 0x2b8   :  { %v1282_v0 = vadd.f32 %v1267_v54, %v1005_v25  ;;  %v4511_v47 = vpop.f32.mrf.mxu1 }
 0x2b9   :  { %v1269_v51 = vpop.f32.mrf.mxu0 }
 0x2ba   :  { %v1283_v1 = vadd.f32 %v1269_v51, %v1007_v38  ;;  %v1557_v30 = vadd.f32 %v1542_v53, %v1282_v0  ;;  %v4513_v32 = vpop.f32.mrf.mxu1 }
 0x2bb   :  { %v1459_v62 = vpop.f32.mrf.mxu0 }
 0x2bc   :  { %v1558_v57 = vadd.f32 %v1544_v17, %v1283_v1  ;;  %v4515_v55 = vpop.f32.mrf.mxu1 }
 0x2bd   :  { %v1461_v19 = vpop.f32.mrf.mxu0 }
 0x2be   :  { %v4517_v22 = vpop.f32.mrf.mxu1 }
 0x2bf   :  { %v1465_v5 = vpop.f32.mrf.mxu0 }
 0x2c0   :  { %v4519_v59 = vpop.f32.mrf.mxu1 }
 0x2c1   :  { %v1467_v31 = vpop.f32.mrf.mxu0 }
 0x2c2   :  { %v4521_v14 = vpop.f32.mrf.mxu1 }
 0x2c3   :  { %4755 = vst [vmem:[#allocation2_spill] sm:$0xff] %v4521_v14  ;;  %v4523_v48 = vpop.f32.mrf.mxu0 }
 0x2c4   :  { %v4525_v49 = vpop.f32.mrf.mxu1 }
 0x2c5   :  { %4756 = vst [vmem:[#allocation3_spill] sm:$0xff] %v4525_v49  ;;  %v4527_v16 = vpop.f32.mrf.mxu0 }
 0x2c6   :  { %v2086_v44 = vpop.f32.mrf.mxu1 }
 0x2c7   :  { %v4529_v12 = vpop.f32.mrf.mxu0 }
 0x2c8   :  { %v4531_v38 = vpop.f32.mrf.mxu1 }
 0x2c9   :  { %4757 = vst [vmem:[#allocation4_spill] sm:$0xff] %v4531_v38  ;;  %v4533_v61 = vpop.f32.mrf.mxu0 }
 0x2ca   :  { %v2092_v29 = vpop.f32.mrf.mxu1 }
 0x2cb   :  { %v1811_v9 = vpop.f32.mrf.mxu0 }
 0x2cc   :  { %v1826_v6 = vadd.f32 %v1811_v9, %v1551_v45  ;;  %v2094_v53 = vpop.f32.mrf.mxu1 }
 0x2cd   :  { %v4535_v56 = vpop.f32.mrf.mxu0 }
 0x2ce   :  { %4758 = vst [vmem:[#allocation5_spill] sm:$0xff] %v4535_v56  ;;  %v4537_v43 = vadd.f32 %v2086_v44, %v1826_v6  ;;  %v2284_v17 = vpop.f32.mrf.mxu1 }
 0x2cf   :  { %v1817_v25 = vpop.f32.mrf.mxu0 }
 0x2d0   :  { %4759 = vst [vmem:[#allocation6_spill] sm:$0xff] %v4537_v43  ;;  %v1832_v54 = vadd.f32 %v1817_v25, %v1557_v30  ;;  %v4539_v0 = vpop.f32.mrf.mxu1  ;;  %v922_v25 = vadd.f32 %v4479_v58, %v4457_v35  ;;  %v930_v58 = vadd.f32 %v4491_v63, %v4465_v39  ;;  %v1273_v63 = vadd.f32 %v4499_v50, %v4475_v52 }
 0x2d1   :  { %v1819_v51 = vpop.f32.mrf.mxu0 }
 0x2d2   :  { %v1833_v1 = vadd.f32 %v1819_v51, %v1558_v57  ;;  %v4541_v24 = vadd.f32 %v2092_v29, %v1832_v54  ;;  %v4543_v38 = vpop.f32.mrf.mxu1  ;;  %v924_v54 = vadd.f32 %v4483_v37, %v4459_v4  ;;  %v1272_v37 = vadd.f32 %v4495_v2, %v4471_v40 }
 0x2d3   :  { %v2009_v49 = vpop.f32.mrf.mxu0  ;;  %v1281_v39 = vadd.f32 %v4481_v18, %v930_v58  ;;  %v853_v2 = vadd.f32 %v4455_v26, %v4453_v60  ;;  %v1548_v60 = vadd.f32 %v4489_v23, %v1273_v63  ;;  %v4765_v63 = vld [vmem:[#allocation3_spill] sm:$0xff] }
 0x2d4   :  { %4760 = vst [vmem:[#allocation7_spill] sm:$0xff] %v4541_v24  ;;  %v4545_v14 = vadd.f32 %v2094_v53, %v1833_v1  ;;  %v4547_v45 = vpop.f32.mrf.mxu1  ;;  %v1274_v1 = vadd.f32 %v4469_v28, %v922_v25  ;;  %v928_v24 = vadd.f32 %v4487_v10, %v4461_v36  ;;  %v1275_v35 = vadd.f32 %v4473_v41, %v924_v54 }
 0x2d5   :  { %v2011_v9 = vpop.f32.mrf.mxu0  ;;  %v851_v10 = vadd.f32 %v4451_v34, %v4449_v15  ;;  %v1556_v18 = vadd.f32 %v1467_v31, %v1281_v39  ;;  %v1279_v52 = vadd.f32 %v4505_v21, %v853_v2  ;;  %v4622_v39 = vpop.permute.xlu1 %2938 }
 0x2d6   :  { %4761 = vst [vmem:[#allocation8_spill] sm:$0xff] %v4545_v14  ;;  %v4549_v56 = vpop.f32.mrf.mxu1  ;;  %v1280_v28 = vadd.f32 %v4477_v7, %v928_v24  ;;  %v1550_v36 = vadd.f32 %v1461_v19, %v1275_v35  ;;  %v1547_v24 = vadd.f32 %v4485_v8, %v1272_v37 }
 0x2d7   :  { %v2015_v44 = vpop.f32.mrf.mxu0  ;;  %v1278_v7 = vadd.f32 %v4501_v42, %v851_v10  ;;  %v1001_v42 = vadd.f32 %v4463_v33, %v4467_v13  ;;  %v1831_v21 = vadd.f32 %v4515_v55, %v1556_v18  ;;  %v1554_v35 = vadd.f32 %v4497_v46, %v1279_v52  ;;  %v4633_v52 = vpop.permute.xlu0 %2943 }
 0x2d8   :  { %v4551_v6 = vpop.f32.mrf.mxu1  ;;  %v1555_v40 = vadd.f32 %v1465_v5, %v1280_v28  ;;  %v1825_v19 = vadd.f32 %v4511_v47, %v1550_v36  ;;  %v1822_v50 = vadd.f32 %v4523_v48, %v1547_v24  ;;  %v1823_v48 = vadd.f32 %v4527_v16, %v1548_v60  ;;  %v4764_v36 = vld [vmem:[#allocation2_spill] sm:$0xff] }
 0x2d9   :  { %v2017_v30 = vpop.f32.mrf.mxu0  ;;  %v1277_v23 = vadd.f32 %v4507_v3, %v1001_v42  ;;  %v1829_v37 = vadd.f32 %v4533_v61, %v1554_v35 }
 0x2da   :  { %v4555_v57 = vpop.f32.mrf.mxu1  ;;  %v1830_v26 = vadd.f32 %v4513_v32, %v1555_v40  ;;  %v2100_v8 = vadd.f32 %v2011_v9, %v1825_v19  ;;  %v2097_v32 = vadd.f32 %v4517_v22, %v1822_v50 }
 0x2db   :  { %4762 = vst [vmem:[#allocation9_spill] sm:$0xff] %v4555_v57  ;;  %v2207_v29 = vpop.f32.mrf.mxu0  ;;  %v1549_v57 = vadd.f32 %v1459_v62, %v1274_v1  ;;  %v1552_v22 = vadd.f32 %v4503_v20, %v1277_v23 }
 0x2dc   :  { %v4559_v53 = vpop.f32.mrf.mxu1  ;;  %v2105_v1 = vadd.f32 %v2015_v44, %v1830_v26  ;;  %v2375_v13 = vadd.f32 %v4539_v0, %v2100_v8  ;;  %v2372_v55 = vadd.f32 %v2207_v29, %v2097_v32 }
 0x2dd   :  { %4763 = vst [vmem:[#allocation10_spill] sm:$0xff] %v4559_v53  ;;  %v4561_v51 = vpop.f32.mrf.mxu0  ;;  %v1824_v62 = vadd.f32 %v4509_v27, %v1549_v57  ;;  %v1553_v57 = vadd.f32 %v4493_v11, %v1278_v7  ;;  %v2106_v11 = vadd.f32 %v2017_v30, %v1831_v21 }
 0x2de   :  { %v4566_v14 = vpop.f32.mrf.mxu1  ;;  %v2380_v46 = vadd.f32 %v4543_v38, %v2105_v1  ;;  %v2647_v38 = vadd.f32 %v4549_v56, %v2372_v55 }
 0x2df   :  { %v4568_v43 = vpop.f32.mrf.mxu0  ;;  %v2099_v54 = vadd.f32 %v2009_v49, %v1824_v62  ;;  %v1828_v9 = vadd.f32 %v4529_v12, %v1553_v57  ;;  %v2381_v0 = vadd.f32 %v4547_v45, %v2106_v11  ;;  %v2104_v62 = vadd.f32 %v4765_v63, %v1829_v37  ;;  %v4767_v57 = vld [vmem:[#allocation4_spill] sm:$0xff] }
 0x2e0   :  { %v4573_v4 = vpop.f32.mrf.mxu1  ;;  %v3044_v63 = vld [vmem:[%s4750_s6 + $0x250] sm:$0xff] }
 0x2e1   :  { %v4577_v53 = vpop.f32.mrf.mxu0  ;;  %v2374_v49 = vadd.f32 %v2284_v17, %v2099_v54  ;;  %v2098_v17 = vadd.f32 %v4519_v59, %v1823_v48  ;;  %v2103_v12 = vadd.f32 %v4764_v36, %v1828_v9  ;;  %v4766_v59 = vld [vmem:[#allocation5_spill] sm:$0xff] }
 0x2e2   :  { %v1827_v40 = vadd.f32 %v4766_v59, %v1552_v22  ;;  %v3042_v59 = vld [vmem:[%s4750_s6 + $0x240] sm:$0xff] }
 0x2e3   :  { %v4582_v25 = vpop.f32.mrf.mxu0  ;;  %v4584_v41 = vpop.f32.mrf.mxu1  ;;  %v2373_v61 = vadd.f32 %v4561_v51, %v2098_v17  ;;  %v2378_v7 = vadd.f32 %v4568_v43, %v2103_v12  ;;  %v2379_v51 = vadd.f32 %v4577_v53, %v2104_v62  ;;  %v3049_v17 = vld [vmem:[%s4750_s6 + $0x278] sm:$0xff]  ;;  %v3043_v62 = vld [vmem:[%s4750_s6 + $0x248] sm:$0xff] }
 0x2e4   :  { %v2102_v43 = vadd.f32 %v4767_v57, %v1827_v40  ;;  %v4769_v53 = vld [vmem:[#allocation10_spill] sm:$0xff]  ;;  %v3041_v40 = vld [vmem:[%s4750_s6 + $0x238] sm:$0xff] }
 0x2e5   :  { %v4594_v15 = vpop.f32.mrf.mxu0  ;;  %v4596_v34 = vpop.f32.mrf.mxu1  ;;  %v2648_v50 = vadd.f32 %v4551_v6, %v2373_v61  ;;  %v2654_v1 = vadd.f32 %v4769_v53, %v2379_v51  ;;  %v3046_v61 = vld [vmem:[%s4750_s6 + $0x260] sm:$0xff]  ;;  %v4773_v51 = vld [vmem:[#allocation7_spill] sm:$0xff] }
 0x2e6   :  { %v2377_v23 = vadd.f32 %v4594_v15, %v2102_v43 }
 0x2e7   :  { %v4601_v27 = vpop.f32.mrf.mxu0  ;;  %v2834_v5 = vpop.f32.mrf.mxu1 }
 0x2e8   :  { %v2652_v15 = vadd.f32 %v4573_v4, %v2377_v23 }
 0x2e9   :  { %v4608_v47 = vpop.f32.mrf.mxu0  ;;  %v2836_v31 = vpop.f32.mrf.mxu1 }
 0x2eb   :  { %v2559_v33 = vpop.f32.mrf.mxu0  ;;  %v2840_v16 = vpop.f32.mrf.mxu1 }
 0x2ec   :  { %v2649_v58 = vadd.f32 %v2559_v33, %v2374_v49 }
 0x2ed   :  { %v2561_v28 = vpop.f32.mrf.mxu0  ;;  %v2842_v24 = vpop.f32.mrf.mxu1 }
 0x2ee   :  { %v2650_v44 = vadd.f32 %v2561_v28, %v2375_v13  ;;  %v2924_v3 = vadd.f32 %v2834_v5, %v2649_v58 }
 0x2ef   :  { %v2565_v10 = vpop.f32.mrf.mxu0 }
 0x2f0   :  { %v2655_v30 = vadd.f32 %v2565_v10, %v2380_v46  ;;  %v2925_v29 = vadd.f32 %v2836_v31, %v2650_v44  ;;  %v2948_v2 = vadd.f32 %v4622_v39, %v2924_v3  ;;  %v4768_v31 = vld [vmem:[#allocation9_spill] sm:$0xff]  ;;  %v3048_v3 = vld [vmem:[%s4750_s6 + $0x270] sm:$0xff]  ;;  %v4770_v10 = vmov 0.0  }
 0x2f1   :  { %v2567_v20 = vpop.f32.mrf.mxu0  ;;  %v2653_v21 = vadd.f32 %v4768_v31, %v2378_v7  ;;  %v3039_v7 = vld [vmem:[%s4750_s6 + $0x228] sm:$0xff] }
 0x2f2   :  { %v2949_v19 = vadd.f32 %v4622_v39, %v2925_v29  ;;  %v2656_v18 = vadd.f32 %v2567_v20, %v2381_v0  ;;  %v2930_v45 = vadd.f32 %v2840_v16, %v2655_v30  ;;  %v2960_v26 = vmax.f32 %v2948_v2, 0.0  ;;  %v3047_v0 = vld [vmem:[%s4750_s6 + $0x268] sm:$0xff]  ;;  %v3045_v29 = vld [vmem:[%s4750_s6 + $0x258] sm:$0xff]  ;;  %v4771_v2 = vld [vmem:[#allocation6_spill] sm:$0xff] }
 0x2f3   :  { %v2757_v54 = vpop.f32.mrf.mxu0  ;;  %v2376_v20 = vadd.f32 %v4582_v25, %v4771_v2 }
 0x2f4   :  { %v2961_v5 = vmax.f32 %v2949_v19, 0.0  ;;  %v2922_v60 = vadd.f32 %v2757_v54, %v2647_v38  ;;  %v2931_v56 = vadd.f32 %v2842_v24, %v2656_v18  ;;  %v2954_v8 = vadd.f32 %v4633_v52, %v2930_v45  ;;  %v3040_v38 = vld [vmem:[%s4750_s6 + $0x230] sm:$0xff]  ;;  %v3038_v45 = vld [vmem:[%s4750_s6 + $0x220] sm:$0xff] }
 0x2f5   :  { %v2759_v42 = vpop.f32.mrf.mxu0  ;;  %v4772_v19 = vld [vmem:[#allocation8_spill] sm:$0xff]  ;;  %v2651_v25 = vadd.f32 %v4566_v14, %v2376_v20  ;;  %v2382_v54 = vadd.f32 %v4601_v27, %v4773_v51 }
 0x2f6   :  { %v2955_v48 = vadd.f32 %v4633_v52, %v2931_v56  ;;  %v2923_v49 = vadd.f32 %v2759_v42, %v2648_v50  ;;  %3196 = vmatprep.mubr.f32.mxu0 %v2961_v5  ;;  %v2946_v35 = vadd.f32 %v4622_v39, %v2922_v60  ;;  %v2966_v13 = vmax.f32 %v2954_v8, 0.0  ;;  %v3036_v14 = vld [vmem:[%s4750_s6 + $0x210] sm:$0xff]  ;;  %v3034_v42 = vld [vmem:[%s4750_s6 + $0x200] sm:$0xff] }
 0x2f7   :  { %v2763_v6 = vpop.f32.mrf.mxu0  ;;  %3197 = vmatmul.mubr.f32.vlgmr.msra.gmra.mxu0 %v2960_v26  ;;  %v2383_v18 = vadd.f32 %v4608_v47, %v4772_v19  ;;  %v3037_v47 = vld [vmem:[%s4750_s6 + $0x218] sm:$0xff]  ;;  %v2657_v27 = vadd.f32 %v4584_v41, %v2382_v54  ;;  %v3035_v26 = vld [vmem:[%s4750_s6 + $0x208] sm:$0xff]  ;;  %v3050_v41 = vld [vmem:[%s4750_s6 + $0x280] sm:$0xff] }
 0x2f8   :  { %v2967_v32 = vmax.f32 %v2955_v48, 0.0  ;;  %v2947_v9 = vadd.f32 %v4622_v39, %v2923_v49  ;;  %v2928_v33 = vadd.f32 %v2763_v6, %v2653_v21  ;;  %v2958_v55 = vmax.f32 %v2946_v35, 0.0  ;;  %v3282_v48 = vld [vmem:[%s4751_s7] sm:$0xff] }
 0x2f9   :  { %v2765_v11 = vpop.f32.mrf.mxu0  ;;  %v2658_v5 = vadd.f32 %v4596_v34, %v2383_v18 }
 0x2fa   :  { %v2959_v58 = vmax.f32 %v2947_v9, 0.0  ;;  %v2929_v37 = vadd.f32 %v2765_v11, %v2654_v1  ;;  %3201 = vmatprep.mubr.f32.mxu0 %v2967_v32  ;;  %v2952_v28 = vadd.f32 %v4633_v52, %v2928_v33 }
 0x2fb   :  { %v2911_v16 = vpop.f32.mrf.mxu0  ;;  %3202 = vmatmul.mubr.f32.gmra.mxu0 %v2966_v13 }
 0x2fc   :  { %v2953_v46 = vadd.f32 %v4633_v52, %v2929_v37  ;;  %3121 = vmatprep.mubr.f32.mxu1 %v2959_v58  ;;  %v2964_v12 = vmax.f32 %v2952_v28, 0.0  ;;  %v2926_v60 = vadd.f32 %v2911_v16, %v2651_v25  ;;  %3544 = vmatprep.mubr.msk.f32.mxu0 %vm3296_vm9, %v3282_v48 }
 0x2fd   :  { %v2913_v44 = vpop.f32.mrf.mxu0  ;;  %3122 = vmatmul.mubr.f32.vlgmr.msra.gmra.mxu1 %v2958_v55 }
 0x2fe   :  { %v2965_v22 = vmax.f32 %v2953_v46, 0.0  ;;  %v2927_v36 = vadd.f32 %v2913_v44, %v2652_v15  ;;  %3208 = vmatpush1.msra.mxu1 %v3049_v17  ;;  %v2950_v34 = vadd.f32 %v4622_v39, %v2926_v60  ;;  %v3283_v44 = vld [vmem:[%s4751_s7 + $0x8] sm:$0x3] }
 0x2ff   :  { %3209 = vmatprep.subr.mxu1 %v4770_v10  ;;  %v2917_v24 = vpop.f32.mrf.mxu0 }
 0x300   :  { %v2951_v4 = vadd.f32 %v4622_v39, %v2927_v36  ;;  %3210 = vmatpush1.msra.mxu1 %v3048_v3  ;;  %3126 = vmatprep.mubr.f32.mxu1 %v2965_v22  ;;  %v2932_v8 = vadd.f32 %v2917_v24, %v2657_v27  ;;  %v2962_v43 = vmax.f32 %v2950_v34, 0.0  ;;  %v3294_v3 = vpop.permute.xlu0 %3293 }
 0x301   :  { %3211 = vmatprep.subr.mxu1 %v4770_v10  ;;  %3127 = vmatmul.mubr.f32.gmra.mxu1 %v2964_v12  ;;  %v2919_v50 = vpop.f32.mrf.mxu0  ;;  %v3289_v12 = vpop.permute.xlu1 %3288 }
 0x302   :  { %v2963_v30 = vmax.f32 %v2951_v4, 0.0  ;;  %3212 = vmatpush1.msra.mxu1 %v3047_v0  ;;  %v2933_v56 = vadd.f32 %v2919_v50, %v2658_v5  ;;  %v2956_v39 = vadd.f32 %v4633_v52, %v2932_v8 }
 0x303   :  { %3213 = vmatprep.subr.mxu1 %v4770_v10 }
 0x304   :  { %3214 = vmatpush1.msra.mxu1 %v3046_v61  ;;  %3456 = vmatprep.mubr.msk.f32.mxu1 %vm534_vm8, %v2963_v30  ;;  %v2957_v57 = vadd.f32 %v4633_v52, %v2933_v56  ;;  %v2968_v21 = vmax.f32 %v2956_v39, 0.0 }
 0x305   :  { %3215 = vmatprep.subr.mxu1 %v4770_v10 }
 0x306   :  { %3216 = vmatpush1.msra.mxu1 %v3045_v29  ;;  %v2969_v31 = vmax.f32 %v2957_v57, 0.0 }
 0x307   :  { %3217 = vmatprep.subr.mxu1 %v4770_v10 }
 0x308   :  { %3218 = vmatpush1.msra.mxu1 %v3044_v63 }
 0x309   :  { %3219 = vmatprep.subr.mxu1 %v4770_v10 }
 0x30a   :  { %3220 = vmatpush1.msra.mxu1 %v3043_v62 }
 0x30b   :  { %3221 = vmatprep.subr.mxu1 %v4770_v10 }
 0x30c   :  { %3222 = vmatpush1.msra.mxu1 %v3042_v59 }
 0x30d   :  { %3223 = vmatprep.subr.mxu1 %v4770_v10 }
 0x30e   :  { %3224 = vmatpush1.msra.mxu1 %v3041_v40 }
 0x30f   :  { %3225 = vmatprep.subr.mxu1 %v4770_v10 }
 0x310   :  { %3226 = vmatpush1.msra.mxu1 %v3040_v38 }
 0x311   :  { %3227 = vmatprep.subr.mxu1 %v4770_v10 }
 0x312   :  { %3228 = vmatpush1.msra.mxu1 %v3039_v7 }
 0x313   :  { %3229 = vmatprep.subr.mxu1 %v4770_v10 }
 0x314   :  { %3230 = vmatpush1.msra.mxu1 %v3038_v45 }
 0x315   :  { %3231 = vmatprep.subr.mxu1 %v4770_v10 }
 0x316   :  { %3232 = vmatpush1.msra.mxu1 %v3037_v47 }
 0x317   :  { %3233 = vmatprep.subr.mxu1 %v4770_v10 }
 0x318   :  { %3234 = vmatpush1.msra.mxu1 %v3036_v14 }
 0x319   :  { %3235 = vmatprep.subr.mxu1 %v4770_v10 }
 0x31a   :  { %3236 = vmatpush1.msra.mxu1 %v3035_v26 }
 0x31b   :  { %3237 = vmatprep.subr.mxu1 %v4770_v10 }
 0x31c   :  { %3238 = vmatpush1.msra.mxu1 %v3034_v42 }
 0x31d   :  { %3269 = vmatprep.subr.mxu1 %v4770_v10 }
 0x31e   :  { %3270 = vmatpush2.msra.mxu1 %v3050_v41 }
 0x31f   :  { %3272 = vmatmul.mubr.f32.vlgmr.msra.gmra.mxu1 %v2962_v43 }
 0x320   :  { %3457 = vmatprep.mubr.msk.f32.mxu1 %vm534_vm8, %v2969_v31 }
 0x323   :  { %3277 = vmatmul.mubr.f32.gmra.mxu1 %v2968_v21 }
 0x3b7   :  { %v3530_v53 = vpop.f32.mrf.mxu0 }
 0x3b9   :  { %v3531_v52 = vpop.f32.mrf.mxu0 }
 0x3ba   :  { %v3532_v37 = vadd.f32 %v3531_v52, %v3530_v53 }
 0x3bb   :  { %v3533_v6 = vpop.f32.mrf.mxu0 }
 0x3bd   :  { %v3492_v49 = vpop.f32.mrf.mxu1  ;;  %v3534_v32 = vpop.f32.mrf.mxu0 }
 0x3be   :  { %v3535_v13 = vadd.f32 %v3534_v32, %v3533_v6 }
 0x3bf   :  { %v3493_v1 = vpop.f32.mrf.mxu1 }
 0x3c0   :  { %v3494_v11 = vadd.f32 %v3493_v1, %v3492_v49 }
 0x3c1   :  { %v3495_v35 = vpop.f32.mrf.mxu1 }
 0x3c2   :  { %v3199_v16 = vadd.f32 %v3532_v37, %v3494_v11 }
 0x3c3   :  { %v3496_v23 = vpop.f32.mrf.mxu1 }
 0x3c4   :  { %v3497_v9 = vadd.f32 %v3496_v23, %v3495_v35 }
 0x3c6   :  { %v3204_v55 = vadd.f32 %v3535_v13, %v3497_v9 }
 0x3df   :  { %v3273_v33 = vpop.f32.mrf.mxu1 }
 0x3e0   :  { %v3274_v46 = vadd.f32 %v3273_v33, %v3199_v16 }
 0x3e1   :  { %v3275_v58 = vpop.f32.mrf.mxu1 }
 0x3e3   :  { %v3278_v28 = vpop.f32.mrf.mxu1 }
 0x3e4   :  { %v3279_v17 = vadd.f32 %v3278_v28, %v3204_v55 }
 0x3e5   :  { %v3280_v15 = vpop.f32.mrf.mxu1 }
 0x3e6   :  { %3540 = vmatprep.subr.mxu0 %v3279_v17 }
 0x3e7   :  { %3541 = vmatpush3.msra.mxu0 %v3279_v17 }
 0x3e8   :  { %3542 = vmatprep.subr.mxu0 %v3274_v46 }
 0x3e9   :  { %3543 = vmatpush3.msra.mxu0 %v3274_v46 }
 0x3ea   :  { %3545 = vmatmul.mubr.msk.f32.vlgmr.msra.gmra.mxu0 %vm3296_vm9, %v3283_v44 }
 0x4aa   :  { %v3546_v22 = vpop.f32.mrf.mxu0 }
 0x4ab   :  { %v3375_v36 = vadd.f32 %v3546_v22, %v3294_v3 }
 0x4ac   :  { %v3369_v10 = vpop.f32.mrf.mxu0 }
 0x4ad   :  { %3381 = vst.msk [vmem:[%s4752_s9 + $0x8] sm:$0x3] %vm3380_vm10, %v3375_v36  ;;  %v3370_v0 = vadd.f32 %v3369_v10, %v3289_v12 }
 0x4af   :  { %3379 = vst.msk [vmem:[%s4752_s9] sm:$0xff] %vm3378_vm11, %v3370_v0 }

</bundles_post_ra>
